<compile_context>
chip_gen: v7x
topology: tpu7x:2x2x1
jax: 0.10.0
libtpu: 0.0.40
codegen_flags: <defaults>
</compile_context>

<pallas_src>
import jax
import jax.numpy as jnp
from jax.experimental import pallas as pl
from jax.experimental.pallas import tpu as pltpu


def _round_up(x, m):
    return ((x + m - 1) // m) * m


def _linear_kernel(x_ref, w_ref, b_ref, o_ref):
    # (bm, F) @ (F, C_pad) on the MXU, f32 accumulation.
    acc = jnp.dot(x_ref[...], w_ref[...], preferred_element_type=jnp.float32)
    acc = acc + b_ref[...].astype(jnp.float32)   # (bm, C_pad) + (1, C_pad)
    o_ref[...] = acc.astype(o_ref.dtype)


def _build_call(B_pad, F, C_pad, bm, out_dtype, elem_bytes, single_buffer_weights):
    grid = (B_pad // bm,)

    if single_buffer_weights:
        # Weights/bias never change across grid steps -> no need to double-buffer.
        w_spec = pl.BlockSpec((F, C_pad), lambda i: (0, 0), pipeline_mode=pl.Buffered(1))
        b_spec = pl.BlockSpec((1, C_pad), lambda i: (0, 0), pipeline_mode=pl.Buffered(1))
    else:
        w_spec = pl.BlockSpec((F, C_pad), lambda i: (0, 0))
        b_spec = pl.BlockSpec((1, C_pad), lambda i: (0, 0))

    cost = pl.CostEstimate(
        flops=2 * B_pad * F * C_pad,
        transcendentals=0,
        bytes_accessed=elem_bytes * (B_pad * F + F * C_pad + C_pad + B_pad * C_pad),
    )

    return pl.pallas_call(
        _linear_kernel,
        out_shape=jax.ShapeDtypeStruct((B_pad, C_pad), out_dtype),
        grid_spec=pltpu.PrefetchScalarGridSpec(
            num_scalar_prefetch=0,
            grid=grid,
            in_specs=[
                pl.BlockSpec((bm, F), lambda i: (i, 0)),   # x row tile
                w_spec,                                    # full (padded) weight
                b_spec,                                    # full (padded) bias
            ],
            out_specs=pl.BlockSpec((bm, C_pad), lambda i: (i, 0)),
        ),
        compiler_params=pltpu.CompilerParams(
            dimension_semantics=("parallel",)),
        cost_estimate=cost,
    )


def linear_forward(x, w, b, *, block_m=256):
    """x: (B, F); w: (F, C)  (transpose of PyTorch's (C, F)); b: (C,) -> (B, C)."""
    B, F = x.shape
    C = w.shape[1]

    # Lane-dense output: pad class dim up to a multiple of 128.
    C_pad = max(128, _round_up(C, 128))

    # Pick the batch tile: as large as block_m allows, multiple of 8 sublanes,
    # never bigger than the (padded) batch.
    bm = min(_round_up(block_m, 8), _round_up(B, 8))
    # Prefer >=2 grid steps (megacore sharding on v7x, pipelining everywhere)
    # as long as each tile still has >=128 rows to fill the MXU.
    if _round_up(B, 8) >= 2 * 128 and pl.cdiv(B, bm) < 2:
        bm = max(128, _round_up(pl.cdiv(B, 2), 8))

    grid_m = pl.cdiv(B, bm)
    B_pad = grid_m * bm

    # Zero-pad batch tail and class dim in the wrapper (cheap XLA pads).
    x_p = x if B_pad == B else jnp.pad(x, ((0, B_pad - B), (0, 0)))
    w_p = w if C_pad == C else jnp.pad(w, ((0, 0), (0, C_pad - C)))
    b_p = (b if C_pad == C else jnp.pad(b, (0, C_pad - C))).reshape(1, C_pad)

    elem_bytes = jnp.dtype(x.dtype).itemsize

    try:
        call = _build_call(B_pad, F, C_pad, bm, x.dtype, elem_bytes,
                           single_buffer_weights=True)
        out = call(x_p, w_p, b_p)
    except Exception:
        # Fallback if this JAX build rejects pipeline_mode=pl.Buffered(1):
        # default double-buffered weights (only costs a little extra VMEM).
        call = _build_call(B_pad, F, C_pad, bm, x.dtype, elem_bytes,
                           single_buffer_weights=False)
        out = call(x_p, w_p, b_p)

    return out[:B, :C]


def init_linear_params(key, n_features, n_classes, dtype=jnp.float32):
    """Mimics PyTorch nn.Linear default init: U[-1/sqrt(in), 1/sqrt(in)].
    Weight is stored as (in, out) = transpose of PyTorch's (out, in)."""
    kw, kb = jax.random.split(key)
    bound = 1.0 / float(n_features) ** 0.5
    w = jax.random.uniform(kw, (n_features, n_classes), dtype, -bound, bound)
    b = jax.random.uniform(kb, (n_classes,), dtype, -bound, bound)
    return w, b


if __name__ == "__main__":
    n_features = 256
    n_classes = 10
    batch = 500      # deliberately NOT a multiple of block_m -> exercises tail padding

    key = jax.random.PRNGKey(0)
    kx, kp = jax.random.split(key)
    x = jax.random.normal(kx, (batch, n_features), jnp.float32)
    w, b = init_linear_params(kp, n_features, n_classes)

    out = jax.block_until_ready(linear_forward(x, w, b))

    # Pure-JAX reference.
    ref = x @ w + b
    assert out.shape == (batch, n_classes)
    assert jnp.allclose(out, ref, atol=1e-4, rtol=1e-4), "mismatch vs reference"

    print("KERNEL_OK")
</pallas_src>

<mosaic_0001>
module attributes {stable_mosaic.version = 11 : i64} {
  func.func @_linear_kernel(%arg0: i32, %arg1: memref<256x256xf32, #tpu.memory_space<vmem>>, %arg2: memref<256x128xf32, #tpu.memory_space<vmem>>, %arg3: memref<1x128xf32, #tpu.memory_space<vmem>>, %arg4: memref<256x128xf32, #tpu.memory_space<vmem>>) attributes {dimension_semantics = [#tpu.dimension_semantics<parallel>], iteration_bounds = array<i64: 2>, scalar_prefetch = 0 : i64, scratch_operands = 0 : i64, tpu.core_type = #tpu.core_type<tc>, window_params = [{transform_indices = @transform_0, window_bounds = array<i64: 256, 256>}, {pipeline_mode = #tpu.pipeline_mode<synchronous>, transform_indices = @transform_1, window_bounds = array<i64: 256, 128>}, {pipeline_mode = #tpu.pipeline_mode<synchronous>, transform_indices = @transform_2, window_bounds = array<i64: 1, 128>}, {transform_indices = @transform_3, window_bounds = array<i64: 256, 128>}]} {
    %c0 = arith.constant 0 : index
    %c0_0 = arith.constant 0 : index
    %0 = vector.load %arg1[%c0, %c0_0] : memref<256x256xf32, #tpu.memory_space<vmem>>, vector<256x256xf32>
    %c0_1 = arith.constant 0 : index
    %c0_2 = arith.constant 0 : index
    %1 = vector.load %arg2[%c0_1, %c0_2] : memref<256x128xf32, #tpu.memory_space<vmem>>, vector<256x128xf32>
    %cst = arith.constant dense<0.000000e+00> : vector<256x128xf32>
    %2 = tpu.matmul %0, %1, %cst {dimension_numbers = #tpu.dot_dimension_numbers<[1], [0], [0], [1], [0, 0, 1, 1], [], []>} : vector<256x256xf32>, vector<256x128xf32>, vector<256x128xf32> -> vector<256x128xf32>
    %c0_3 = arith.constant 0 : index
    %c0_4 = arith.constant 0 : index
    %3 = vector.load %arg3[%c0_3, %c0_4] : memref<1x128xf32, #tpu.memory_space<vmem>>, vector<1x128xf32>
    %4 = vector.broadcast %3 : vector<1x128xf32> to vector<256x128xf32>
    %5 = arith.addf %2, %4 : vector<256x128xf32>
    %c0_5 = arith.constant 0 : index
    %c0_6 = arith.constant 0 : index
    %6 = vector.load %arg4[%c0_5, %c0_6] : memref<256x128xf32, #tpu.memory_space<vmem>>, vector<256x128xf32>
    tpu.vector_store %arg4[%c0_5, %c0_6], %5 {strides = array<i32>} : memref<256x128xf32, #tpu.memory_space<vmem>>, vector<256x128xf32>,
    return
  }
  func.func @transform_0(%arg0: i32) -> (i32, i32) {
    %c0_i32 = arith.constant 0 : i32
    %c0_i32_0 = arith.constant 0 : i32
    return %arg0, %c0_i32 : i32, i32
  }
  func.func @transform_1(%arg0: i32) -> (i32, i32) {
    %c0_i32 = arith.constant 0 : i32
    %c0_i32_0 = arith.constant 0 : i32
    %c0_i32_1 = arith.constant 0 : i32
    return %c0_i32, %c0_i32_0 : i32, i32
  }
  func.func @transform_2(%arg0: i32) -> (i32, i32) {
    %c0_i32 = arith.constant 0 : i32
    %c0_i32_0 = arith.constant 0 : i32
    %c0_i32_1 = arith.constant 0 : i32
    return %c0_i32, %c0_i32_0 : i32, i32
  }
  func.func @transform_3(%arg0: i32) -> (i32, i32) {
    %c0_i32 = arith.constant 0 : i32
    %c0_i32_0 = arith.constant 0 : i32
    return %arg0, %c0_i32 : i32, i32
  }
}

module attributes {stable_mosaic.version = 11 : i64} {
  func.func @_linear_kernel(%arg0: i32, %arg1: memref<256x256xf32, #tpu.memory_space<vmem>>, %arg2: memref<256x128xf32, #tpu.memory_space<vmem>>, %arg3: memref<1x128xf32, #tpu.memory_space<vmem>>, %arg4: memref<256x128xf32, #tpu.memory_space<vmem>>) attributes {dimension_semantics = [#tpu.dimension_semantics<parallel>], iteration_bounds = array<i64: 2>, scalar_prefetch = 0 : i64, scratch_operands = 0 : i64, tpu.core_type = #tpu.core_type<tc>, window_params = [{transform_indices = @transform_0, window_bounds = array<i64: 256, 256>}, {pipeline_mode = #tpu.pipeline_mode<synchronous>, transform_indices = @transform_1, window_bounds = array<i64: 256, 128>}, {pipeline_mode = #tpu.pipeline_mode<synchronous>, transform_indices = @transform_2, window_bounds = array<i64: 1, 128>}, {transform_indices = @transform_3, window_bounds = array<i64: 256, 128>}]} {
    %c0 = arith.constant 0 : index
    %c0_0 = arith.constant 0 : index
    %0 = vector.load %arg1[%c0, %c0_0] : memref<256x256xf32, #tpu.memory_space<vmem>>, vector<256x256xf32>
    %c0_1 = arith.constant 0 : index
    %c0_2 = arith.constant 0 : index
    %1 = vector.load %arg2[%c0_1, %c0_2] : memref<256x128xf32, #tpu.memory_space<vmem>>, vector<256x128xf32>
    %cst = arith.constant dense<0.000000e+00> : vector<256x128xf32>
    %2 = tpu.matmul %0, %1, %cst {dimension_numbers = #tpu.dot_dimension_numbers<[1], [0], [0], [1], [0, 0, 1, 1], [], []>} : vector<256x256xf32>, vector<256x128xf32>, vector<256x128xf32> -> vector<256x128xf32>
    %c0_3 = arith.constant 0 : index
    %c0_4 = arith.constant 0 : index
    %3 = vector.load %arg3[%c0_3, %c0_4] : memref<1x128xf32, #tpu.memory_space<vmem>>, vector<1x128xf32>
    %4 = vector.broadcast %3 : vector<1x128xf32> to vector<256x128xf32>
    %5 = arith.addf %2, %4 : vector<256x128xf32>
    %c0_5 = arith.constant 0 : index
    %c0_6 = arith.constant 0 : index
    %6 = vector.load %arg4[%c0_5, %c0_6] : memref<256x128xf32, #tpu.memory_space<vmem>>, vector<256x128xf32>
    tpu.vector_store %arg4[%c0_5, %c0_6], %5 {strides = array<i32>} : memref<256x128xf32, #tpu.memory_space<vmem>>, vector<256x128xf32>,
    return
  }
  func.func @transform_0(%arg0: i32) -> (i32, i32) {
    %c0_i32 = arith.constant 0 : i32
    %c0_i32_0 = arith.constant 0 : i32
    return %arg0, %c0_i32 : i32, i32
  }
  func.func @transform_1(%arg0: i32) -> (i32, i32) {
    %c0_i32 = arith.constant 0 : i32
    %c0_i32_0 = arith.constant 0 : i32
    %c0_i32_1 = arith.constant 0 : i32
    return %c0_i32, %c0_i32_0 : i32, i32
  }
  func.func @transform_2(%arg0: i32) -> (i32, i32) {
    %c0_i32 = arith.constant 0 : i32
    %c0_i32_0 = arith.constant 0 : i32
    %c0_i32_1 = arith.constant 0 : i32
    return %c0_i32, %c0_i32_0 : i32, i32
  }
  func.func @transform_3(%arg0: i32) -> (i32, i32) {
    %c0_i32 = arith.constant 0 : i32
    %c0_i32_0 = arith.constant 0 : i32
    return %arg0, %c0_i32 : i32, i32
  }
}

</mosaic_0001>

<bundles_post_ra>
// kernel: tpu_custom_call.1
= control target key start
LH: loop header
LB: loop body
LE: loop exit
PB: predicated region body
PF: predicated region fallthrough
CT: control target
= control target key end

     0   :  { %8 = vsyncpa [#allocation3], 0  ;;  %s1361_s0 = inlined_call_operand.hbm [shape: f32[512,256], index: 0, kind: input, shape index: {}]   ;;  %s1362_s1 = inlined_call_operand.hbm [shape: f32[256,128], index: 1, kind: input, shape index: {}]   ;;  %s1363_s2 = inlined_call_operand.vmem [shape: f32[1,128], index: 2, kind: input, shape index: {}]   ;;  %s1364_s3 = inlined_call_operand.hbm [shape: f32[512,128], index: 3, kind: output, shape index: {}]  }
   0x1   :  { %10 = vsyncpa [#allocation3 + $0x1], 0 }
   0x2   :  { %11 = vsyncpa [#allocation6], 0 }
   0x3   :  { %12 = vsyncpa [#allocation4], 0 }
   0x4   :  { %14 = vsyncpa [#allocation4 + $0x1], 0  ;;  %s989_s12 = smov 0   ;;  %s991_s13 = smov 0  }
   0x5   :  { %s993_s14 = smov 0   ;;  %s995_s15 = smov 0  }
   0x6 LB: > { %s1010_s16 = sadd.s32 4294967295, %s957_s15   ;;  %s664_s17 = sadd.s32 4294967294, %s957_s15   ;;  %s957_s15 = sphi %s995_s15, %s1384_s15   ;;  %s953_s14 = sphi %s993_s14, %s1383_s14   ;;  %s949_s13 = sphi %s991_s13, %s1382_s13   ;;  %s945_s12 = sphi %s989_s12, %s1381_s12  }
   0x7   : > { %p40_p0 = scmp.ne.s32.totalorder %s949_s13, %s945_s12  ;;  %p1365_p1 = scmp.eq.s32.totalorder %s1010_s16, 0 }
   0x8   : > { %p112_p3 = scmp.eq.s32.totalorder %s664_s17, 1  ;;  %p665_p5 = scmp.ge.s32.totalorder %s957_s15, 1 }
   0x9   : > { %p1019_p4 = por %p1365_p1, %p40_p0  ;;  %p119_p7 = scmp.lt.s32.totalorder %s957_s15, 3 }
   0xa   : > { %p1024_p6 = por %p112_p3, %p40_p0  ;;  %s959_s21 = smov [#allocation5]  }
   0xb   : > { %s1368_s18 = scalar_select %p1019_p4, 1, 0 }
   0xc   : > { %s1369_s19 = scalar_select %p1024_p6, 1, 0 }
   0xd   : > { %p1029_p8 = pnand %p665_p5, %p119_p7  ;;  %s131_s22 = sshll.u32 %s959_s21, 4  ;;  %s1033_s22 = int_to_ptr.vmem [resolvable:$true] %s131_s22 }
   0xe   : > { %s1045_s24 = sadd.s32 1, %s957_s15   ;;  %s27_s25 = sadd.s32 1, %s953_s14 }
   0xf   : > { %s1370_s20 = scalar_select %p1029_p8, 1, 0 }
  0x10   : > { %p773_p9 = pneg %p1029_p8  ;;  %s24_s26 = ssub.s32 %s957_s15, %s1045_s24 }
  0x11   : > { %s829_s29 = scalar_lea.hbm %s1362_s1, 4096 }
  0x12   : > { %p1040_p11 = pnand %p773_p9, %p1365_p1  ;;  %p830_p12 = scmp.ne.s32.totalorder %s1362_s1, %s829_s29 }
  0x13   : > { %p836_p5 = scmp.lt.u32.totalorder %s829_s29, %s1362_s1 }
  0x14   : > { %p831_p13 = pneg %p1040_p11 }
  0x16   : > { %p832_p0 = pnand %p831_p13, %p830_p12 }
  0x18   : > { %p833_p3 = pneg %p832_p0 }
  0x1a   : > { %p838_p7 = pnand %p836_p5, %p833_p3 }
  0x1c   : > { %841 = shalt.err (!%p838_p7)
}
  0x1d   : > { %s842_s7 = scalar_lea.vmem %s1033_s22, 4096  ;;  %p850_p2 = scmp.lt.s32.totalorder %s1033_s22, %s1033_s22 }
  0x1e   : > { %p843_p9 = scmp.ne.s32.totalorder %s1033_s22, %s842_s7  ;;  %p851_p6 = scmp.lt.s32.totalorder %s842_s7, %s842_s7 }
  0x20   : > { %p845_p10 = pnand %p843_p9, %p831_p13  ;;  %p852_p4 = por %p851_p6, %p850_p2 }
  0x22   : > { %p846_p1 = pneg %p845_p10 }
  0x24   : > { %p853_p8 = pnand %p852_p4, %p846_p1 }
  0x26   : > { %856 = shalt.err (!%p853_p8)
}
  0x27   : > { %s960_s8 = smov 128   ;;  %s961_s9 = smov 8  }
  0x28   : > { %776 = dma.hbm_to_vmem [thread:$0]  (!%p1040_p11), %s1362_s1, 4096, %s1033_s22, [#allocation6], %s960_s8, %s960_s8, %s961_s9  }
  0x29   : > { %p25_p2 = scmp.eq.s32.totalorder %s24_s26, 0  ;;  %p34_p1 = scmp.ne.s32.totalorder %s953_s14, %s949_s13 }
  0x2a   : > { %p35_p4 = scmp.eq.s32.totalorder %s957_s15, 0  ;;  %p786_p6 = scmp.lt.s32.totalorder %s957_s15, 2 }
  0x2b   : > { %s1076_s17 = scalar_select %p25_p2, %s953_s14, %s27_s25  }
  0x2c   : > { %p36_p8 = por %p35_p4, %p34_p1  ;;  %p1372_p10 = scmp.eq.s32.totalorder %s1010_s16, 1 }
  0x2d   : > { %s148_s27 = sand.u32 1, %s953_s14   ;;  %s683_s28 = sshll.u32 %s957_s15, 13 }
  0x2e   : > { %p1080_p12 = por %p1372_p10, %p34_p1  ;;  %s668_s29 = sshll.u32 %s148_s27, 9 }
  0x2f   : > { %s1089_s4 = scalar_lea.hbm %s1361_s0, %s683_s28  ;;  %s152_s22 = scalar_lea.vmem [#allocation2], %s668_s29 }
  0x30   : > { %s160_s25 = sshll.u32 %s152_s22, 4  ;;  %p1091_p11 = pnand %p786_p6, %p36_p8  ;;  %s1095_s25 = int_to_ptr.vmem [resolvable:$true] %s160_s25 }
  0x31   : > { %s1097_s5 = scalar_lea.sflag [#allocation3], %s148_s27  ;;  %s857_s6 = scalar_lea.hbm %s1089_s4, 8192 }
  0x32   : > { %p858_p13 = scmp.ne.s32.totalorder %s1089_s4, %s857_s6  ;;  %p859_p0 = pneg %p1091_p11 }
  0x33   : > { %s862_s9 = scalar_lea.hbm %s1361_s0, 16384  ;;  %p863_p7 = scmp.lt.u32.totalorder %s1089_s4, %s1361_s0 }
  0x34   : > { %p860_p3 = pnand %p859_p0, %p858_p13  ;;  %p864_p9 = scmp.lt.u32.totalorder %s862_s9, %s857_s6 }
  0x35   : > { %p866_p1 = scmp.lt.u32.totalorder %s857_s6, %s1089_s4 }
  0x36   : > { %p861_p5 = pneg %p860_p3  ;;  %p865_p2 = por %p864_p9, %p863_p7 }
  0x38   : > { %p867_p4 = por %p866_p1, %p865_p2 }
  0x3a   : > { %p868_p6 = pnand %p867_p4, %p861_p5 }
  0x3c   : > { %871 = shalt.err (!%p868_p6)
}
  0x3d   : > { %s872_s27 = scalar_lea.vmem %s1095_s25, 8192  ;;  %s962_s28 = smov [#allocation2]  }
  0x3e   : > { %p873_p8 = scmp.ne.s32.totalorder %s1095_s25, %s872_s27  ;;  %s877_s29 = sshll.u32 %s962_s28, 4  ;;  %s878_s29 = int_to_ptr.vmem [resolvable:$false] %s877_s29 }
  0x3f   : > { %s879_s23 = scalar_lea.vmem %s878_s29, 16384  ;;  %p880_p3 = scmp.lt.s32.totalorder %s1095_s25, %s878_s29 }
  0x40   : > { %p875_p10 = pnand %p873_p8, %p859_p0  ;;  %p881_p7 = scmp.lt.s32.totalorder %s879_s23, %s872_s27 }
  0x42   : > { %p876_p13 = pneg %p875_p10  ;;  %p882_p9 = por %p881_p7, %p880_p3 }
  0x44   : > { %p883_p2 = pnand %p882_p9, %p876_p13 }
  0x46   : > { %886 = shalt.err (!%p883_p2)
}
  0x47   : > { %s963_s30 = smov 256   ;;  %s964_s22 = smov 16  }
  0x48   : > { %780 = dma.hbm_to_vmem [thread:$0]  (!%p1091_p11), %s1089_s4, 8192, %s1095_s25, %s1097_s5, %s963_s30, %s963_s30, %s964_s22  }
  0x49   : > { %p1375_p0 = scmp.ne.s32.totalorder %s1370_s20, 0 }
  0x4a   : > { %s1128_s6 = sand.u32 (!%p1375_p0), 1, %s949_s13   ;;  %p1376_p5 = scmp.ne.s32.totalorder (!%p1375_p0), %s1368_s18, 0 }
  0x4b   : > { %172 = sbr.rel (%p1375_p0) target bundleno = 441 (0x1b9), region = 32  ;;  %s673_s7 = sshll.u32 (!%p1375_p0), %s1128_s6, 9 }
  0x4c   : > { %s175_s8 = scalar_lea.sflag (!%p1375_p0), [#allocation3], %s1128_s6  ;;  %s1132_s9 = scalar_lea.vmem (!%p1375_p0), [#allocation2], %s673_s7 }
  0x52   : > { %932 = dma.done.wait (%p1376_p5), %s175_s8, 8192  }
  0x53   : > { %934 = vsyncadd (%p1376_p5), %s175_s8, 4294959104  ;;  %p1377_p11 = scmp.eq.s32.totalorder %s1010_s16, 0 }
  0x55   : > { %936 = dma.done.wait (%p1377_p11), [#allocation6], 4096   ;;  %p1378_p1 = pmov %p1377_p11 }
  0x56   : > { %v965_v0 = vmov 0.0|0.0   ;;  %v271_v1 = vld [vmem:[#allocation5] sm:$0xff]  ;;  %v272_v2 = vld [vmem:[#allocation5 + $0x8] sm:$0xff]  ;;  %v273_v3 = vld [vmem:[#allocation5 + $0x10] sm:$0xff]  ;;  %s675_s18 = sshll.u32 %s1128_s6, 8  ;;  %s684_s26 = sshll.u32 %s1010_s16, 12 }
  0x57   : > { %938 = vsyncadd (%p1378_p1), [#allocation6], 4294963200  ;;  %685 = vmatprep.subr.bf16.mxu0 %v965_v0  ;;  %733 = vmatprep.subr.bf16.mxu1 %v965_v0  ;;  %v686_v4 = vpack.c.bf16 %v272_v2, %v271_v1  ;;  %v274_v5 = vld [vmem:[#allocation5 + $0x18] sm:$0xff]  ;;  %v275_v7 = vld [vmem:[#allocation5 + $0x20] sm:$0xff]  ;;  %s1246_s25 = scalar_lea.vmem [#allocation7], %s675_s18  ;;  %s1311_s27 = scalar_lea.hbm %s1364_s3, %s684_s26 }
  0x58   : > { %v689_v6 = vpack.c.bf16 %v274_v5, %v273_v3  ;;  %v276_v8 = vld [vmem:[#allocation5 + $0x28] sm:$0xff]  ;;  %v277_v10 = vld [vmem:[#allocation5 + $0x30] sm:$0xff]  ;;  %v278_v11 = vld [vmem:[#allocation5 + $0x38] sm:$0xff]  ;;  %s581_s5 = sshll.u32 %s1246_s25, 4  ;;  %s568_s16 = scalar_lea.sflag [#allocation4], %s1128_s6  ;;  %s1313_s5 = int_to_ptr.vmem [resolvable:$true] %s581_s5 }
  0x59   : > { %687 = vmatpush1.bf16.msra.mxu0 %v686_v4  ;;  %749 = vmatpush1.bf16.msra.mxu1 %v686_v4  ;;  %v692_v9 = vpack.c.bf16 %v276_v8, %v275_v7  ;;  %v208_v12 = vld [vmem:[%s1132_s9 + $0x8] sm:$0xff]  ;;  %v695_v13 = vpack.c.bf16 %v278_v11, %v277_v10  ;;  %v279_v15 = vld [vmem:[#allocation5 + $0x40] sm:$0xff]  ;;  %v281_v18 = vld [vmem:[#allocation5 + $0x50] sm:$0xff]  ;;  %s887_s28 = scalar_lea.vmem %s1313_s5, 4096  ;;  %s966_s29 = smov [#allocation7]  }
  0x5a   : > { %688 = vmatprep.subr.bf16.mxu0 %v965_v0  ;;  %734 = vmatprep.subr.bf16.mxu1 %v965_v0  ;;  %v240_v14 = vld [vmem:[%s1132_s9 + $0x108] sm:$0xff]  ;;  %v282_v19 = vld [vmem:[#allocation5 + $0x58] sm:$0xff]  ;;  %v283_v21 = vld [vmem:[#allocation5 + $0x60] sm:$0xff]  ;;  %p888_p4 = scmp.ne.s32.totalorder %s1313_s5, %s887_s28  ;;  %s891_s23 = sshll.u32 %s966_s29, 4  ;;  %s892_s23 = int_to_ptr.vmem [resolvable:$false] %s891_s23 }
  0x5b   : > { %v280_v16 = vld [vmem:[#allocation5 + $0x48] sm:$0xff]  ;;  %374 = vmatprep.mubr.f32.mxu0 %v208_v12  ;;  %454 = vmatprep.mubr.f32.mxu1 %v240_v14  ;;  %v701_v20 = vpack.c.bf16 %v282_v19, %v281_v18  ;;  %v285_v24 = vld [vmem:[#allocation5 + $0x70] sm:$0xff]  ;;  %v286_v25 = vld [vmem:[#allocation5 + $0x78] sm:$0xff]  ;;  %s893_s30 = scalar_lea.vmem %s892_s23, 8192  ;;  %p894_p10 = scmp.lt.s32.totalorder %s1313_s5, %s892_s23 }
  0x5c   : > { %v698_v17 = vpack.c.bf16 %v280_v16, %v279_v15  ;;  %v284_v22 = vld [vmem:[#allocation5 + $0x68] sm:$0xff]  ;;  %v707_v26 = vpack.c.bf16 %v286_v25, %v285_v24  ;;  %v287_v27 = vld [vmem:[#allocation5 + $0x80] sm:$0xff]  ;;  %v289_v30 = vld [vmem:[#allocation5 + $0x90] sm:$0xff]  ;;  %p889_p6 = pnand %p888_p4, %p1080_p12  ;;  %p895_p13 = scmp.lt.s32.totalorder %s893_s30, %s887_s28 }
  0x5d   : > { %690 = vmatpush1.bf16.msra.mxu0 %v689_v6  ;;  %750 = vmatpush1.bf16.msra.mxu1 %v689_v6  ;;  %v704_v23 = vpack.c.bf16 %v284_v22, %v283_v21  ;;  %v288_v28 = vld [vmem:[#allocation5 + $0x88] sm:$0xff]  ;;  %v290_v31 = vld [vmem:[#allocation5 + $0x98] sm:$0xff]  ;;  %v291_v33 = vld [vmem:[#allocation5 + $0xa0] sm:$0xff] }
  0x5e   : > { %691 = vmatprep.subr.bf16.mxu0 %v965_v0  ;;  %735 = vmatprep.subr.bf16.mxu1 %v965_v0  ;;  %v710_v29 = vpack.c.bf16 %v288_v28, %v287_v27  ;;  %v713_v32 = vpack.c.bf16 %v290_v31, %v289_v30  ;;  %v292_v34 = vld [vmem:[#allocation5 + $0xa8] sm:$0xff]  ;;  %v293_v36 = vld [vmem:[#allocation5 + $0xb0] sm:$0xff]  ;;  %v294_v37 = vld [vmem:[#allocation5 + $0xb8] sm:$0xff]  ;;  %p890_p8 = pneg %p889_p6  ;;  %p896_p3 = por %p895_p13, %p894_p10 }
  0x5f   : > { %v716_v35 = vpack.c.bf16 %v292_v34, %v291_v33  ;;  %v719_v38 = vpack.c.bf16 %v294_v37, %v293_v36  ;;  %v295_v39 = vld [vmem:[#allocation5 + $0xc0] sm:$0xff]  ;;  %v296_v40 = vld [vmem:[#allocation5 + $0xc8] sm:$0xff]  ;;  %v297_v42 = vld [vmem:[#allocation5 + $0xd0] sm:$0xff] }
  0x60   : > { %v722_v41 = vpack.c.bf16 %v296_v40, %v295_v39  ;;  %v298_v43 = vld [vmem:[#allocation5 + $0xd8] sm:$0xff]  ;;  %v299_v45 = vld [vmem:[#allocation5 + $0xe0] sm:$0xff]  ;;  %v300_v46 = vld [vmem:[#allocation5 + $0xe8] sm:$0xff]  ;;  %p897_p7 = pnand %p896_p3, %p890_p8 }
  0x61   : > { %693 = vmatpush1.bf16.msra.mxu0 %v692_v9  ;;  %751 = vmatpush1.bf16.msra.mxu1 %v692_v9  ;;  %v725_v44 = vpack.c.bf16 %v298_v43, %v297_v42  ;;  %v728_v47 = vpack.c.bf16 %v300_v46, %v299_v45  ;;  %v301_v48 = vld [vmem:[#allocation5 + $0xf0] sm:$0xff]  ;;  %v302_v49 = vld [vmem:[#allocation5 + $0xf8] sm:$0xff]  ;;  %v207_v51 = vld [vmem:[%s1132_s9] sm:$0xff] }
  0x62   : > { %694 = vmatprep.subr.bf16.mxu0 %v965_v0  ;;  %736 = vmatprep.subr.bf16.mxu1 %v965_v0  ;;  %v731_v50 = vpack.c.bf16 %v302_v49, %v301_v48  ;;  %v239_v52 = vld [vmem:[%s1132_s9 + $0x100] sm:$0xff]  ;;  %v210_v53 = vld [vmem:[%s1132_s9 + $0x18] sm:$0xff]  ;;  %v209_v55 = vld [vmem:[%s1132_s9 + $0x10] sm:$0xff] }
  0x63   : > { %v242_v54 = vld [vmem:[%s1132_s9 + $0x118] sm:$0xff]  ;;  %v241_v56 = vld [vmem:[%s1132_s9 + $0x110] sm:$0xff]  ;;  %v212_v57 = vld [vmem:[%s1132_s9 + $0x28] sm:$0xff] }
  0x64   : > { %v244_v58 = vld [vmem:[%s1132_s9 + $0x128] sm:$0xff]  ;;  %v211_v59 = vld [vmem:[%s1132_s9 + $0x20] sm:$0xff]  ;;  %v214_v61 = vld [vmem:[%s1132_s9 + $0x38] sm:$0xff] }
  0x65   : > { %696 = vmatpush1.bf16.msra.mxu0 %v695_v13  ;;  %752 = vmatpush1.bf16.msra.mxu1 %v695_v13  ;;  %v243_v60 = vld [vmem:[%s1132_s9 + $0x120] sm:$0xff]  ;;  %v246_v62 = vld [vmem:[%s1132_s9 + $0x138] sm:$0xff]  ;;  %v213_v63 = vld [vmem:[%s1132_s9 + $0x30] sm:$0xff] }
  0x66   : > { %697 = vmatprep.subr.bf16.mxu0 %v965_v0  ;;  %737 = vmatprep.subr.bf16.mxu1 %v965_v0  ;;  %v216_v1 = vld [vmem:[%s1132_s9 + $0x48] sm:$0xff]  ;;  %v215_v3 = vld [vmem:[%s1132_s9 + $0x40] sm:$0xff]  ;;  %v218_v5 = vld [vmem:[%s1132_s9 + $0x58] sm:$0xff] }
  0x67   : > { %v248_v2 = vld [vmem:[%s1132_s9 + $0x148] sm:$0xff]  ;;  %v247_v4 = vld [vmem:[%s1132_s9 + $0x140] sm:$0xff]  ;;  %v250_v6 = vld [vmem:[%s1132_s9 + $0x158] sm:$0xff] }
  0x68   : > { %v217_v7 = vld [vmem:[%s1132_s9 + $0x50] sm:$0xff]  ;;  %v220_v9 = vld [vmem:[%s1132_s9 + $0x68] sm:$0xff]  ;;  %v219_v11 = vld [vmem:[%s1132_s9 + $0x60] sm:$0xff] }
  0x69   : > { %699 = vmatpush1.bf16.msra.mxu0 %v698_v17  ;;  %753 = vmatpush1.bf16.msra.mxu1 %v698_v17  ;;  %v249_v8 = vld [vmem:[%s1132_s9 + $0x150] sm:$0xff]  ;;  %v252_v10 = vld [vmem:[%s1132_s9 + $0x168] sm:$0xff]  ;;  %v251_v12 = vld [vmem:[%s1132_s9 + $0x160] sm:$0xff] }
  0x6a   : > { %700 = vmatprep.subr.bf16.mxu0 %v965_v0  ;;  %738 = vmatprep.subr.bf16.mxu1 %v965_v0  ;;  %v222_v13 = vld [vmem:[%s1132_s9 + $0x78] sm:$0xff]  ;;  %v221_v15 = vld [vmem:[%s1132_s9 + $0x70] sm:$0xff]  ;;  %v224_v17 = vld [vmem:[%s1132_s9 + $0x88] sm:$0xff] }
  0x6b   : > { %v254_v14 = vld [vmem:[%s1132_s9 + $0x178] sm:$0xff]  ;;  %v253_v16 = vld [vmem:[%s1132_s9 + $0x170] sm:$0xff]  ;;  %v256_v18 = vld [vmem:[%s1132_s9 + $0x188] sm:$0xff] }
  0x6c   : > { %v223_v19 = vld [vmem:[%s1132_s9 + $0x80] sm:$0xff]  ;;  %v226_v21 = vld [vmem:[%s1132_s9 + $0x98] sm:$0xff]  ;;  %v257_v24 = vld [vmem:[%s1132_s9 + $0x190] sm:$0xff] }
  0x6d   : > { %702 = vmatpush1.bf16.msra.mxu0 %v701_v20  ;;  %754 = vmatpush1.bf16.msra.mxu1 %v701_v20  ;;  %v255_v20 = vld [vmem:[%s1132_s9 + $0x180] sm:$0xff]  ;;  %v258_v22 = vld [vmem:[%s1132_s9 + $0x198] sm:$0xff]  ;;  %v228_v25 = vld [vmem:[%s1132_s9 + $0xa8] sm:$0xff] }
  0x6e   : > { %703 = vmatprep.subr.bf16.mxu0 %v965_v0  ;;  %739 = vmatprep.subr.bf16.mxu1 %v965_v0  ;;  %v227_v27 = vld [vmem:[%s1132_s9 + $0xa0] sm:$0xff]  ;;  %v262_v30 = vld [vmem:[%s1132_s9 + $0x1b8] sm:$0xff]  ;;  %v229_v31 = vld [vmem:[%s1132_s9 + $0xb0] sm:$0xff] }
  0x6f   : > { %v259_v28 = vld [vmem:[%s1132_s9 + $0x1a0] sm:$0xff]  ;;  %v232_v33 = vld [vmem:[%s1132_s9 + $0xc8] sm:$0xff]  ;;  %v234_v37 = vld [vmem:[%s1132_s9 + $0xd8] sm:$0xff] }
  0x70   : > { %v264_v34 = vld [vmem:[%s1132_s9 + $0x1c8] sm:$0xff]  ;;  %v263_v36 = vld [vmem:[%s1132_s9 + $0x1c0] sm:$0xff]  ;;  %v233_v39 = vld [vmem:[%s1132_s9 + $0xd0] sm:$0xff] }
  0x71   : > { %705 = vmatpush1.bf16.msra.mxu0 %v704_v23  ;;  %755 = vmatpush1.bf16.msra.mxu1 %v704_v23  ;;  %v225_v23 = vld [vmem:[%s1132_s9 + $0x90] sm:$0xff]  ;;  %v268_v42 = vld [vmem:[%s1132_s9 + $0x1e8] sm:$0xff]  ;;  %v235_v43 = vld [vmem:[%s1132_s9 + $0xe0] sm:$0xff] }
  0x72   : > { %706 = vmatprep.subr.bf16.mxu0 %v965_v0  ;;  %740 = vmatprep.subr.bf16.mxu1 %v965_v0  ;;  %v265_v40 = vld [vmem:[%s1132_s9 + $0x1d0] sm:$0xff]  ;;  %v238_v45 = vld [vmem:[%s1132_s9 + $0xf8] sm:$0xff]  ;;  %v1242_v49 = vld [vmem:[%s1363_s2] ss:$0 sm:$0xff] }
  0x73   : > { %v270_v46 = vld [vmem:[%s1132_s9 + $0x1f8] sm:$0xff]  ;;  %v269_v48 = vld [vmem:[%s1132_s9 + $0x1f0] sm:$0xff] }
  0x75   : > { %708 = vmatpush1.bf16.msra.mxu0 %v707_v26  ;;  %756 = vmatpush1.bf16.msra.mxu1 %v707_v26  ;;  %v260_v26 = vld [vmem:[%s1132_s9 + $0x1a8] sm:$0xff] }
  0x76   : > { %709 = vmatprep.subr.bf16.mxu0 %v965_v0  ;;  %741 = vmatprep.subr.bf16.mxu1 %v965_v0 }
  0x79   : > { %711 = vmatpush1.bf16.msra.mxu0 %v710_v29  ;;  %757 = vmatpush1.bf16.msra.mxu1 %v710_v29  ;;  %v230_v29 = vld [vmem:[%s1132_s9 + $0xb8] sm:$0xff] }
  0x7a   : > { %712 = vmatprep.subr.bf16.mxu0 %v965_v0  ;;  %742 = vmatprep.subr.bf16.mxu1 %v965_v0 }
  0x7d   : > { %714 = vmatpush1.bf16.msra.mxu0 %v713_v32  ;;  %758 = vmatpush1.bf16.msra.mxu1 %v713_v32  ;;  %v261_v32 = vld [vmem:[%s1132_s9 + $0x1b0] sm:$0xff] }
  0x7e   : > { %715 = vmatprep.subr.bf16.mxu0 %v965_v0  ;;  %743 = vmatprep.subr.bf16.mxu1 %v965_v0 }
  0x81   : > { %717 = vmatpush1.bf16.msra.mxu0 %v716_v35  ;;  %759 = vmatpush1.bf16.msra.mxu1 %v716_v35  ;;  %v231_v35 = vld [vmem:[%s1132_s9 + $0xc0] sm:$0xff] }
  0x82   : > { %718 = vmatprep.subr.bf16.mxu0 %v965_v0  ;;  %744 = vmatprep.subr.bf16.mxu1 %v965_v0 }
  0x85   : > { %720 = vmatpush1.bf16.msra.mxu0 %v719_v38  ;;  %760 = vmatpush1.bf16.msra.mxu1 %v719_v38  ;;  %v266_v38 = vld [vmem:[%s1132_s9 + $0x1d8] sm:$0xff] }
  0x86   : > { %721 = vmatprep.subr.bf16.mxu0 %v965_v0  ;;  %745 = vmatprep.subr.bf16.mxu1 %v965_v0 }
  0x89   : > { %723 = vmatpush1.bf16.msra.mxu0 %v722_v41  ;;  %761 = vmatpush1.bf16.msra.mxu1 %v722_v41  ;;  %v236_v41 = vld [vmem:[%s1132_s9 + $0xe8] sm:$0xff] }
  0x8a   : > { %724 = vmatprep.subr.bf16.mxu0 %v965_v0  ;;  %746 = vmatprep.subr.bf16.mxu1 %v965_v0 }
  0x8d   : > { %726 = vmatpush1.bf16.msra.mxu0 %v725_v44  ;;  %762 = vmatpush1.bf16.msra.mxu1 %v725_v44  ;;  %v267_v44 = vld [vmem:[%s1132_s9 + $0x1e0] sm:$0xff] }
  0x8e   : > { %727 = vmatprep.subr.bf16.mxu0 %v965_v0  ;;  %747 = vmatprep.subr.bf16.mxu1 %v965_v0 }
  0x91   : > { %729 = vmatpush1.bf16.msra.mxu0 %v728_v47  ;;  %763 = vmatpush1.bf16.msra.mxu1 %v728_v47  ;;  %v237_v47 = vld [vmem:[%s1132_s9 + $0xf0] sm:$0xff] }
  0x92   : > { %730 = vmatprep.subr.bf16.mxu0 %v965_v0  ;;  %748 = vmatprep.subr.bf16.mxu1 %v965_v0  ;;  %v245_v0 = vld [vmem:[%s1132_s9 + $0x130] sm:$0xff] }
  0x95   : > { %732 = vmatpush1.bf16.msra.mxu0 %v731_v50  ;;  %764 = vmatpush1.bf16.msra.mxu1 %v731_v50 }
  0x98   : > { %375 = vmatmul.mubr.f32.vlgmr.msra.gmra.mrb[0].mxu0 %v207_v51  ;;  %455 = vmatmul.mubr.f32.vlgmr.msra.gmra.mrb[0].mxu1 %v239_v52 }
  0x99   : > { %379 = vmatprep.mubr.f32.mxu0 %v210_v53  ;;  %459 = vmatprep.mubr.f32.mxu1 %v242_v54 }
  0x9c   : > { %380 = vmatmul.mubr.f32.gmra.mrb[2].mxu0 %v209_v55  ;;  %460 = vmatmul.mubr.f32.gmra.mrb[2].mxu1 %v241_v56 }
  0x9d   : > { %384 = vmatprep.mubr.f32.mxu0 %v212_v57  ;;  %464 = vmatprep.mubr.f32.mxu1 %v244_v58 }
  0xa0   : > { %385 = vmatmul.mubr.f32.gmra.mrb[4].mxu0 %v211_v59  ;;  %465 = vmatmul.mubr.f32.gmra.mrb[4].mxu1 %v243_v60 }
  0xa1   : > { %389 = vmatprep.mubr.f32.mxu0 %v214_v61  ;;  %469 = vmatprep.mubr.f32.mxu1 %v246_v62 }
  0xa4   : > { %390 = vmatmul.mubr.f32.gmra.mrb[6].mxu0 %v213_v63  ;;  %470 = vmatmul.mubr.f32.gmra.mrb[6].mxu1 %v245_v0 }
  0xa5   : > { %394 = vmatprep.mubr.f32.mxu0 %v216_v1  ;;  %474 = vmatprep.mubr.f32.mxu1 %v248_v2 }
  0xa8   : > { %395 = vmatmul.mubr.f32.gmra.mrb[8].mxu0 %v215_v3  ;;  %475 = vmatmul.mubr.f32.gmra.mrb[8].mxu1 %v247_v4 }
  0xa9   : > { %399 = vmatprep.mubr.f32.mxu0 %v218_v5  ;;  %479 = vmatprep.mubr.f32.mxu1 %v250_v6 }
  0xac   : > { %400 = vmatmul.mubr.f32.gmra.mrb[10].mxu0 %v217_v7  ;;  %480 = vmatmul.mubr.f32.gmra.mrb[10].mxu1 %v249_v8 }
  0xad   : > { %404 = vmatprep.mubr.f32.mxu0 %v220_v9  ;;  %484 = vmatprep.mubr.f32.mxu1 %v252_v10 }
  0xb0   : > { %405 = vmatmul.mubr.f32.gmra.mrb[12].mxu0 %v219_v11  ;;  %485 = vmatmul.mubr.f32.gmra.mrb[12].mxu1 %v251_v12 }
  0xb1   : > { %409 = vmatprep.mubr.f32.mxu0 %v222_v13  ;;  %489 = vmatprep.mubr.f32.mxu1 %v254_v14 }
  0xb4   : > { %410 = vmatmul.mubr.f32.gmra.mrb[14].mxu0 %v221_v15  ;;  %490 = vmatmul.mubr.f32.gmra.mrb[14].mxu1 %v253_v16 }
  0xb5   : > { %414 = vmatprep.mubr.f32.mxu0 %v224_v17  ;;  %494 = vmatprep.mubr.f32.mxu1 %v256_v18 }
  0xb8   : > { %415 = vmatmul.mubr.f32.gmra.mrb[16].mxu0 %v223_v19  ;;  %495 = vmatmul.mubr.f32.gmra.mrb[16].mxu1 %v255_v20 }
  0xb9   : > { %419 = vmatprep.mubr.f32.mxu0 %v226_v21  ;;  %499 = vmatprep.mubr.f32.mxu1 %v258_v22 }
  0xbc   : > { %420 = vmatmul.mubr.f32.gmra.mrb[18].mxu0 %v225_v23  ;;  %500 = vmatmul.mubr.f32.gmra.mrb[18].mxu1 %v257_v24 }
  0xbd   : > { %424 = vmatprep.mubr.f32.mxu0 %v228_v25  ;;  %504 = vmatprep.mubr.f32.mxu1 %v260_v26 }
  0xc0   : > { %425 = vmatmul.mubr.f32.gmra.mrb[20].mxu0 %v227_v27  ;;  %505 = vmatmul.mubr.f32.gmra.mrb[20].mxu1 %v259_v28 }
  0xc1   : > { %429 = vmatprep.mubr.f32.mxu0 %v230_v29  ;;  %509 = vmatprep.mubr.f32.mxu1 %v262_v30 }
  0xc4   : > { %430 = vmatmul.mubr.f32.gmra.mrb[22].mxu0 %v229_v31  ;;  %510 = vmatmul.mubr.f32.gmra.mrb[22].mxu1 %v261_v32 }
  0xc5   : > { %434 = vmatprep.mubr.f32.mxu0 %v232_v33  ;;  %514 = vmatprep.mubr.f32.mxu1 %v264_v34 }
  0xc8   : > { %435 = vmatmul.mubr.f32.gmra.mrb[24].mxu0 %v231_v35  ;;  %515 = vmatmul.mubr.f32.gmra.mrb[24].mxu1 %v263_v36 }
  0xc9   : > { %439 = vmatprep.mubr.f32.mxu0 %v234_v37  ;;  %519 = vmatprep.mubr.f32.mxu1 %v266_v38 }
  0xcc   : > { %440 = vmatmul.mubr.f32.gmra.mrb[26].mxu0 %v233_v39  ;;  %520 = vmatmul.mubr.f32.gmra.mrb[26].mxu1 %v265_v40 }
  0xcd   : > { %444 = vmatprep.mubr.f32.mxu0 %v236_v41  ;;  %524 = vmatprep.mubr.f32.mxu1 %v268_v42 }
  0xd0   : > { %445 = vmatmul.mubr.f32.gmra.mrb[28].mxu0 %v235_v43  ;;  %525 = vmatmul.mubr.f32.gmra.mrb[28].mxu1 %v267_v44 }
  0xd1   : > { %449 = vmatprep.mubr.f32.mxu0 %v238_v45  ;;  %529 = vmatprep.mubr.f32.mxu1 %v270_v46 }
  0xd4   : > { %450 = vmatmul.mubr.f32.gmra.mrb[30].mxu0 %v237_v47  ;;  %530 = vmatmul.mubr.f32.gmra.mrb[30].mxu1 %v269_v48 }
 0x16b   : > { %v376_v50 = vpop.f32.mrb[0].mxu0  ;;  %v456_v51 = vpop.f32.mrb[0].mxu1 }
 0x16c   : > { %v377_v52 = vadd.f32 %v1242_v49, %v376_v50  ;;  %v457_v53 = vadd.f32 %v1242_v49, %v456_v51  ;;  %v378_v54 = vpop.f32.mrb[1].mxu0  ;;  %v458_v55 = vpop.f32.mrb[1].mxu1 }
 0x16e   : > { %535 = vst [vmem:[%s1246_s25] sm:$0xff] %v377_v52  ;;  %551 = vst [vmem:[%s1246_s25 + $0x80] sm:$0xff] %v457_v53 }
 0x16f   : > { %v381_v56 = vpop.f32.mrb[2].mxu0  ;;  %v461_v57 = vpop.f32.mrb[2].mxu1 }
 0x170   : > { %v382_v58 = vadd.f32 %v1242_v49, %v381_v56  ;;  %v462_v59 = vadd.f32 %v1242_v49, %v461_v57  ;;  %v383_v60 = vpop.f32.mrb[3].mxu0  ;;  %v463_v61 = vpop.f32.mrb[3].mxu1 }
 0x172   : > { %536 = vst [vmem:[%s1246_s25 + $0x8] sm:$0xff] %v382_v58  ;;  %552 = vst [vmem:[%s1246_s25 + $0x88] sm:$0xff] %v462_v59 }
 0x173   : > { %v386_v62 = vpop.f32.mrb[4].mxu0  ;;  %v466_v63 = vpop.f32.mrb[4].mxu1 }
 0x174   : > { %v387_v0 = vadd.f32 %v1242_v49, %v386_v62  ;;  %v467_v1 = vadd.f32 %v1242_v49, %v466_v63  ;;  %v388_v2 = vpop.f32.mrb[5].mxu0  ;;  %v468_v3 = vpop.f32.mrb[5].mxu1 }
 0x176   : > { %537 = vst [vmem:[%s1246_s25 + $0x10] sm:$0xff] %v387_v0  ;;  %553 = vst [vmem:[%s1246_s25 + $0x90] sm:$0xff] %v467_v1 }
 0x177   : > { %v391_v4 = vpop.f32.mrb[6].mxu0  ;;  %v471_v5 = vpop.f32.mrb[6].mxu1 }
 0x178   : > { %v392_v6 = vadd.f32 %v1242_v49, %v391_v4  ;;  %v472_v7 = vadd.f32 %v1242_v49, %v471_v5  ;;  %v393_v8 = vpop.f32.mrb[7].mxu0  ;;  %v473_v9 = vpop.f32.mrb[7].mxu1 }
 0x17a   : > { %538 = vst [vmem:[%s1246_s25 + $0x18] sm:$0xff] %v392_v6  ;;  %554 = vst [vmem:[%s1246_s25 + $0x98] sm:$0xff] %v472_v7 }
 0x17b   : > { %v396_v10 = vpop.f32.mrb[8].mxu0  ;;  %v476_v11 = vpop.f32.mrb[8].mxu1 }
 0x17c   : > { %v397_v12 = vadd.f32 %v1242_v49, %v396_v10  ;;  %v477_v13 = vadd.f32 %v1242_v49, %v476_v11  ;;  %v398_v14 = vpop.f32.mrb[9].mxu0  ;;  %v478_v15 = vpop.f32.mrb[9].mxu1 }
 0x17e   : > { %539 = vst [vmem:[%s1246_s25 + $0x20] sm:$0xff] %v397_v12  ;;  %555 = vst [vmem:[%s1246_s25 + $0xa0] sm:$0xff] %v477_v13 }
 0x17f   : > { %v401_v16 = vpop.f32.mrb[10].mxu0  ;;  %v481_v17 = vpop.f32.mrb[10].mxu1 }
 0x180   : > { %v402_v18 = vadd.f32 %v1242_v49, %v401_v16  ;;  %v482_v19 = vadd.f32 %v1242_v49, %v481_v17  ;;  %v403_v20 = vpop.f32.mrb[11].mxu0  ;;  %v483_v21 = vpop.f32.mrb[11].mxu1 }
 0x182   : > { %540 = vst [vmem:[%s1246_s25 + $0x28] sm:$0xff] %v402_v18  ;;  %556 = vst [vmem:[%s1246_s25 + $0xa8] sm:$0xff] %v482_v19 }
 0x183   : > { %v406_v22 = vpop.f32.mrb[12].mxu0  ;;  %v486_v23 = vpop.f32.mrb[12].mxu1 }
 0x184   : > { %v407_v24 = vadd.f32 %v1242_v49, %v406_v22  ;;  %v487_v25 = vadd.f32 %v1242_v49, %v486_v23  ;;  %v408_v26 = vpop.f32.mrb[13].mxu0  ;;  %v488_v27 = vpop.f32.mrb[13].mxu1 }
 0x186   : > { %541 = vst [vmem:[%s1246_s25 + $0x30] sm:$0xff] %v407_v24  ;;  %557 = vst [vmem:[%s1246_s25 + $0xb0] sm:$0xff] %v487_v25 }
 0x187   : > { %v411_v28 = vpop.f32.mrb[14].mxu0  ;;  %v491_v29 = vpop.f32.mrb[14].mxu1 }
 0x188   : > { %v412_v30 = vadd.f32 %v1242_v49, %v411_v28  ;;  %v492_v31 = vadd.f32 %v1242_v49, %v491_v29  ;;  %v413_v32 = vpop.f32.mrb[15].mxu0  ;;  %v493_v33 = vpop.f32.mrb[15].mxu1 }
 0x18a   : > { %542 = vst [vmem:[%s1246_s25 + $0x38] sm:$0xff] %v412_v30  ;;  %558 = vst [vmem:[%s1246_s25 + $0xb8] sm:$0xff] %v492_v31 }
 0x18b   : > { %v416_v34 = vpop.f32.mrb[16].mxu0  ;;  %v496_v35 = vpop.f32.mrb[16].mxu1 }
 0x18c   : > { %v417_v36 = vadd.f32 %v1242_v49, %v416_v34  ;;  %v497_v37 = vadd.f32 %v1242_v49, %v496_v35  ;;  %v418_v38 = vpop.f32.mrb[17].mxu0  ;;  %v498_v39 = vpop.f32.mrb[17].mxu1 }
 0x18e   : > { %543 = vst [vmem:[%s1246_s25 + $0x40] sm:$0xff] %v417_v36  ;;  %559 = vst [vmem:[%s1246_s25 + $0xc0] sm:$0xff] %v497_v37 }
 0x18f   : > { %v421_v40 = vpop.f32.mrb[18].mxu0  ;;  %v501_v41 = vpop.f32.mrb[18].mxu1 }
 0x190   : > { %v422_v42 = vadd.f32 %v1242_v49, %v421_v40  ;;  %v502_v43 = vadd.f32 %v1242_v49, %v501_v41  ;;  %v423_v44 = vpop.f32.mrb[19].mxu0  ;;  %v503_v45 = vpop.f32.mrb[19].mxu1 }
 0x192   : > { %544 = vst [vmem:[%s1246_s25 + $0x48] sm:$0xff] %v422_v42  ;;  %560 = vst [vmem:[%s1246_s25 + $0xc8] sm:$0xff] %v502_v43 }
 0x193   : > { %v426_v46 = vpop.f32.mrb[20].mxu0  ;;  %v506_v47 = vpop.f32.mrb[20].mxu1 }
 0x194   : > { %v427_v48 = vadd.f32 %v1242_v49, %v426_v46  ;;  %v507_v50 = vadd.f32 %v1242_v49, %v506_v47  ;;  %v428_v51 = vpop.f32.mrb[21].mxu0  ;;  %v508_v52 = vpop.f32.mrb[21].mxu1 }
 0x196   : > { %545 = vst [vmem:[%s1246_s25 + $0x50] sm:$0xff] %v427_v48  ;;  %561 = vst [vmem:[%s1246_s25 + $0xd0] sm:$0xff] %v507_v50 }
 0x197   : > { %v431_v53 = vpop.f32.mrb[22].mxu0  ;;  %v511_v54 = vpop.f32.mrb[22].mxu1 }
 0x198   : > { %v432_v55 = vadd.f32 %v1242_v49, %v431_v53  ;;  %v512_v56 = vadd.f32 %v1242_v49, %v511_v54  ;;  %v433_v57 = vpop.f32.mrb[23].mxu0  ;;  %v513_v58 = vpop.f32.mrb[23].mxu1 }
 0x19a   : > { %546 = vst [vmem:[%s1246_s25 + $0x58] sm:$0xff] %v432_v55  ;;  %562 = vst [vmem:[%s1246_s25 + $0xd8] sm:$0xff] %v512_v56 }
 0x19b   : > { %v436_v59 = vpop.f32.mrb[24].mxu0  ;;  %v516_v60 = vpop.f32.mrb[24].mxu1 }
 0x19c   : > { %v437_v61 = vadd.f32 %v1242_v49, %v436_v59  ;;  %v517_v62 = vadd.f32 %v1242_v49, %v516_v60  ;;  %v438_v63 = vpop.f32.mrb[25].mxu0  ;;  %v518_v0 = vpop.f32.mrb[25].mxu1 }
 0x19e   : > { %547 = vst [vmem:[%s1246_s25 + $0x60] sm:$0xff] %v437_v61  ;;  %563 = vst [vmem:[%s1246_s25 + $0xe0] sm:$0xff] %v517_v62 }
 0x19f   : > { %v441_v1 = vpop.f32.mrb[26].mxu0  ;;  %v521_v2 = vpop.f32.mrb[26].mxu1 }
 0x1a0   : > { %v442_v3 = vadd.f32 %v1242_v49, %v441_v1  ;;  %v522_v4 = vadd.f32 %v1242_v49, %v521_v2  ;;  %v443_v5 = vpop.f32.mrb[27].mxu0  ;;  %v523_v6 = vpop.f32.mrb[27].mxu1 }
 0x1a2   : > { %548 = vst [vmem:[%s1246_s25 + $0x68] sm:$0xff] %v442_v3  ;;  %564 = vst [vmem:[%s1246_s25 + $0xe8] sm:$0xff] %v522_v4 }
 0x1a3   : > { %v446_v7 = vpop.f32.mrb[28].mxu0  ;;  %v526_v8 = vpop.f32.mrb[28].mxu1 }
 0x1a4   : > { %v447_v9 = vadd.f32 %v1242_v49, %v446_v7  ;;  %v527_v10 = vadd.f32 %v1242_v49, %v526_v8  ;;  %v448_v11 = vpop.f32.mrb[29].mxu0  ;;  %v528_v12 = vpop.f32.mrb[29].mxu1 }
 0x1a6   : > { %549 = vst [vmem:[%s1246_s25 + $0x70] sm:$0xff] %v447_v9  ;;  %565 = vst [vmem:[%s1246_s25 + $0xf0] sm:$0xff] %v527_v10 }
 0x1a7   : > { %v451_v13 = vpop.f32.mrb[30].mxu0  ;;  %v531_v14 = vpop.f32.mrb[30].mxu1 }
 0x1a8   : > { %v452_v15 = vadd.f32 %v1242_v49, %v451_v13  ;;  %v532_v16 = vadd.f32 %v1242_v49, %v531_v14  ;;  %v453_v17 = vpop.f32.mrb[31].mxu0  ;;  %v533_v18 = vpop.f32.mrb[31].mxu1 }
 0x1aa   : > { %550 = vst [vmem:[%s1246_s25 + $0x78] sm:$0xff] %v452_v15  ;;  %566 = vst [vmem:[%s1246_s25 + $0xf8] sm:$0xff] %v532_v16 }
 0x1ab   : > { %900 = shalt.err (!%p897_p7)
}
 0x1ac   : > { %s901_s22 = scalar_lea.hbm %s1311_s27, 4096  ;;  %s905_s9 = scalar_lea.hbm %s1364_s3, 8192 }
 0x1ad   : > { %p902_p9 = scmp.ne.s32.totalorder %s1311_s27, %s901_s22  ;;  %p906_p5 = scmp.lt.u32.totalorder %s1311_s27, %s1364_s3 }
 0x1ae   : > { %p907_p11 = scmp.lt.u32.totalorder %s905_s9, %s901_s22  ;;  %p909_p4 = scmp.lt.u32.totalorder %s901_s22, %s1311_s27 }
 0x1af   : > { %p903_p2 = pnand %p902_p9, %p1080_p12 }
 0x1b0   : > { %p908_p1 = por %p907_p11, %p906_p5 }
 0x1b1   : > { %p904_p0 = pneg %p903_p2 }
 0x1b2   : > { %p910_p6 = por %p909_p4, %p908_p1 }
 0x1b4   : > { %p911_p8 = pnand %p910_p6, %p904_p0 }
 0x1b6   : > { %914 = shalt.err (!%p911_p8)
}
 0x1b7   : > { %s967_s4 = smov 128   ;;  %s968_s25 = smov 8  }
 0x1b8   : > { %771 = dma.vmem_to_hbm [thread:$0]  (%p1080_p12), %s1313_s5, 4096, %s1311_s27, %s568_s16, %s967_s4, %s967_s4, %s968_s25  }
 0x1b9 PF: > { %s596_s26 = sand.u32 1, %s945_s12   ;;  %p1379_p10 = scmp.ne.s32.totalorder %s1369_s19, 0 }
 0x1ba   : > { %p1380_p13 = scmp.ge.s32.totalorder %s957_s15, 2  ;;  %s597_s10 = scalar_lea.sflag [#allocation4], %s596_s26 }
 0x1bc   : > { %p782_p3 = pnand %p1380_p13, %p1379_p10 }
 0x1be   : > { %940 = dma.done.wait (!%p782_p3), %s597_s10, 4096  }
 0x1bf   : > { %942 = vsyncadd (!%p782_p3), %s597_s10, 4294963200  ;;  %p17_p7 = scmp.ge.s32.totalorder %s1045_s24, 4   ;;  %s1381_s12 = smov %s949_s13 }
 0x1c0   : > { %s1382_s13 = smov %s953_s14  ;;  %s1383_s14 = smov %s1076_s17 }
 0x1c1   : > { %s1384_s15 = smov %s1045_s24  ;;  %19 = sbr.rel (!%p17_p7) target bundleno = 6 (0x6), region = 81 }
 0x1c8   :  { %602 = vsyncpa [#allocation3], 1 }
 0x1c9   :  { %604 = vsyncpa [#allocation3 + $0x1], 1 }
 0x1ca   :  { %605 = vsyncpa [#allocation6], 1 }
 0x1cb   :  { %606 = vsyncpa [#allocation4], 1 }
 0x1cc   :  { %608 = vsyncpa [#allocation4 + $0x1], 1 }

// kernel: tpu_custom_call.1
= control target key start
LH: loop header
LB: loop body
LE: loop exit
PB: predicated region body
PF: predicated region fallthrough
CT: control target
= control target key end

     0   :  { %8 = vsyncpa [#allocation3], 0  ;;  %s1361_s0 = inlined_call_operand.hbm [shape: f32[512,256], index: 0, kind: input, shape index: {}]   ;;  %s1362_s1 = inlined_call_operand.hbm [shape: f32[256,128], index: 1, kind: input, shape index: {}]   ;;  %s1363_s2 = inlined_call_operand.vmem [shape: f32[1,128], index: 2, kind: input, shape index: {}]   ;;  %s1364_s3 = inlined_call_operand.hbm [shape: f32[512,128], index: 3, kind: output, shape index: {}]  }
   0x1   :  { %10 = vsyncpa [#allocation3 + $0x1], 0 }
   0x2   :  { %11 = vsyncpa [#allocation6], 0 }
   0x3   :  { %12 = vsyncpa [#allocation4], 0 }
   0x4   :  { %14 = vsyncpa [#allocation4 + $0x1], 0  ;;  %s989_s12 = smov 0   ;;  %s991_s13 = smov 0  }
   0x5   :  { %s993_s14 = smov 0   ;;  %s995_s15 = smov 0  }
   0x6 LB: > { %s1010_s16 = sadd.s32 4294967295, %s957_s15   ;;  %s664_s17 = sadd.s32 4294967294, %s957_s15   ;;  %s957_s15 = sphi %s995_s15, %s1384_s15   ;;  %s953_s14 = sphi %s993_s14, %s1383_s14   ;;  %s949_s13 = sphi %s991_s13, %s1382_s13   ;;  %s945_s12 = sphi %s989_s12, %s1381_s12  }
   0x7   : > { %p40_p0 = scmp.ne.s32.totalorder %s949_s13, %s945_s12  ;;  %p1365_p1 = scmp.eq.s32.totalorder %s1010_s16, 0 }
   0x8   : > { %p112_p3 = scmp.eq.s32.totalorder %s664_s17, 1  ;;  %p665_p5 = scmp.ge.s32.totalorder %s957_s15, 1 }
   0x9   : > { %p1019_p4 = por %p1365_p1, %p40_p0  ;;  %p119_p7 = scmp.lt.s32.totalorder %s957_s15, 3 }
   0xa   : > { %p1024_p6 = por %p112_p3, %p40_p0  ;;  %s959_s21 = smov [#allocation5]  }
   0xb   : > { %s1368_s18 = scalar_select %p1019_p4, 1, 0 }
   0xc   : > { %s1369_s19 = scalar_select %p1024_p6, 1, 0 }
   0xd   : > { %p1029_p8 = pnand %p665_p5, %p119_p7  ;;  %s131_s22 = sshll.u32 %s959_s21, 4  ;;  %s1033_s22 = int_to_ptr.vmem [resolvable:$true] %s131_s22 }
   0xe   : > { %s1045_s24 = sadd.s32 1, %s957_s15   ;;  %s27_s25 = sadd.s32 1, %s953_s14 }
   0xf   : > { %s1370_s20 = scalar_select %p1029_p8, 1, 0 }
  0x10   : > { %p773_p9 = pneg %p1029_p8  ;;  %s24_s26 = ssub.s32 %s957_s15, %s1045_s24 }
  0x11   : > { %s829_s29 = scalar_lea.hbm %s1362_s1, 4096 }
  0x12   : > { %p1040_p11 = pnand %p773_p9, %p1365_p1  ;;  %p830_p12 = scmp.ne.s32.totalorder %s1362_s1, %s829_s29 }
  0x13   : > { %p836_p5 = scmp.lt.u32.totalorder %s829_s29, %s1362_s1 }
  0x14   : > { %p831_p13 = pneg %p1040_p11 }
  0x16   : > { %p832_p0 = pnand %p831_p13, %p830_p12 }
  0x18   : > { %p833_p3 = pneg %p832_p0 }
  0x1a   : > { %p838_p7 = pnand %p836_p5, %p833_p3 }
  0x1c   : > { %841 = shalt.err (!%p838_p7)
}
  0x1d   : > { %s842_s7 = scalar_lea.vmem %s1033_s22, 4096  ;;  %p850_p2 = scmp.lt.s32.totalorder %s1033_s22, %s1033_s22 }
  0x1e   : > { %p843_p9 = scmp.ne.s32.totalorder %s1033_s22, %s842_s7  ;;  %p851_p6 = scmp.lt.s32.totalorder %s842_s7, %s842_s7 }
  0x20   : > { %p845_p10 = pnand %p843_p9, %p831_p13  ;;  %p852_p4 = por %p851_p6, %p850_p2 }
  0x22   : > { %p846_p1 = pneg %p845_p10 }
  0x24   : > { %p853_p8 = pnand %p852_p4, %p846_p1 }
  0x26   : > { %856 = shalt.err (!%p853_p8)
}
  0x27   : > { %s960_s8 = smov 128   ;;  %s961_s9 = smov 8  }
  0x28   : > { %776 = dma.hbm_to_vmem [thread:$0]  (!%p1040_p11), %s1362_s1, 4096, %s1033_s22, [#allocation6], %s960_s8, %s960_s8, %s961_s9  }
  0x29   : > { %p25_p2 = scmp.eq.s32.totalorder %s24_s26, 0  ;;  %p34_p1 = scmp.ne.s32.totalorder %s953_s14, %s949_s13 }
  0x2a   : > { %p35_p4 = scmp.eq.s32.totalorder %s957_s15, 0  ;;  %p786_p6 = scmp.lt.s32.totalorder %s957_s15, 2 }
  0x2b   : > { %s1076_s17 = scalar_select %p25_p2, %s953_s14, %s27_s25  }
  0x2c   : > { %p36_p8 = por %p35_p4, %p34_p1  ;;  %p1372_p10 = scmp.eq.s32.totalorder %s1010_s16, 1 }
  0x2d   : > { %s148_s27 = sand.u32 1, %s953_s14   ;;  %s683_s28 = sshll.u32 %s957_s15, 13 }
  0x2e   : > { %p1080_p12 = por %p1372_p10, %p34_p1  ;;  %s668_s29 = sshll.u32 %s148_s27, 9 }
  0x2f   : > { %s1089_s4 = scalar_lea.hbm %s1361_s0, %s683_s28  ;;  %s152_s22 = scalar_lea.vmem [#allocation2], %s668_s29 }
  0x30   : > { %s160_s25 = sshll.u32 %s152_s22, 4  ;;  %p1091_p11 = pnand %p786_p6, %p36_p8  ;;  %s1095_s25 = int_to_ptr.vmem [resolvable:$true] %s160_s25 }
  0x31   : > { %s1097_s5 = scalar_lea.sflag [#allocation3], %s148_s27  ;;  %s857_s6 = scalar_lea.hbm %s1089_s4, 8192 }
  0x32   : > { %p858_p13 = scmp.ne.s32.totalorder %s1089_s4, %s857_s6  ;;  %p859_p0 = pneg %p1091_p11 }
  0x33   : > { %s862_s9 = scalar_lea.hbm %s1361_s0, 16384  ;;  %p863_p7 = scmp.lt.u32.totalorder %s1089_s4, %s1361_s0 }
  0x34   : > { %p860_p3 = pnand %p859_p0, %p858_p13  ;;  %p864_p9 = scmp.lt.u32.totalorder %s862_s9, %s857_s6 }
  0x35   : > { %p866_p1 = scmp.lt.u32.totalorder %s857_s6, %s1089_s4 }
  0x36   : > { %p861_p5 = pneg %p860_p3  ;;  %p865_p2 = por %p864_p9, %p863_p7 }
  0x38   : > { %p867_p4 = por %p866_p1, %p865_p2 }
  0x3a   : > { %p868_p6 = pnand %p867_p4, %p861_p5 }
  0x3c   : > { %871 = shalt.err (!%p868_p6)
}
  0x3d   : > { %s872_s27 = scalar_lea.vmem %s1095_s25, 8192  ;;  %s962_s28 = smov [#allocation2]  }
  0x3e   : > { %p873_p8 = scmp.ne.s32.totalorder %s1095_s25, %s872_s27  ;;  %s877_s29 = sshll.u32 %s962_s28, 4  ;;  %s878_s29 = int_to_ptr.vmem [resolvable:$false] %s877_s29 }
  0x3f   : > { %s879_s23 = scalar_lea.vmem %s878_s29, 16384  ;;  %p880_p3 = scmp.lt.s32.totalorder %s1095_s25, %s878_s29 }
  0x40   : > { %p875_p10 = pnand %p873_p8, %p859_p0  ;;  %p881_p7 = scmp.lt.s32.totalorder %s879_s23, %s872_s27 }
  0x42   : > { %p876_p13 = pneg %p875_p10  ;;  %p882_p9 = por %p881_p7, %p880_p3 }
  0x44   : > { %p883_p2 = pnand %p882_p9, %p876_p13 }
  0x46   : > { %886 = shalt.err (!%p883_p2)
}
  0x47   : > { %s963_s30 = smov 256   ;;  %s964_s22 = smov 16  }
  0x48   : > { %780 = dma.hbm_to_vmem [thread:$0]  (!%p1091_p11), %s1089_s4, 8192, %s1095_s25, %s1097_s5, %s963_s30, %s963_s30, %s964_s22  }
  0x49   : > { %p1375_p0 = scmp.ne.s32.totalorder %s1370_s20, 0 }
  0x4a   : > { %s1128_s6 = sand.u32 (!%p1375_p0), 1, %s949_s13   ;;  %p1376_p5 = scmp.ne.s32.totalorder (!%p1375_p0), %s1368_s18, 0 }
  0x4b   : > { %172 = sbr.rel (%p1375_p0) target bundleno = 441 (0x1b9), region = 32  ;;  %s673_s7 = sshll.u32 (!%p1375_p0), %s1128_s6, 9 }
  0x4c   : > { %s175_s8 = scalar_lea.sflag (!%p1375_p0), [#allocation3], %s1128_s6  ;;  %s1132_s9 = scalar_lea.vmem (!%p1375_p0), [#allocation2], %s673_s7 }
  0x52   : > { %932 = dma.done.wait (%p1376_p5), %s175_s8, 8192  }
  0x53   : > { %934 = vsyncadd (%p1376_p5), %s175_s8, 4294959104  ;;  %p1377_p11 = scmp.eq.s32.totalorder %s1010_s16, 0 }
  0x55   : > { %936 = dma.done.wait (%p1377_p11), [#allocation6], 4096   ;;  %p1378_p1 = pmov %p1377_p11 }
  0x56   : > { %v965_v0 = vmov 0.0|0.0   ;;  %v271_v1 = vld [vmem:[#allocation5] sm:$0xff]  ;;  %v272_v2 = vld [vmem:[#allocation5 + $0x8] sm:$0xff]  ;;  %v273_v3 = vld [vmem:[#allocation5 + $0x10] sm:$0xff]  ;;  %s675_s18 = sshll.u32 %s1128_s6, 8  ;;  %s684_s26 = sshll.u32 %s1010_s16, 12 }
  0x57   : > { %938 = vsyncadd (%p1378_p1), [#allocation6], 4294963200  ;;  %685 = vmatprep.subr.bf16.mxu0 %v965_v0  ;;  %733 = vmatprep.subr.bf16.mxu1 %v965_v0  ;;  %v686_v4 = vpack.c.bf16 %v272_v2, %v271_v1  ;;  %v274_v5 = vld [vmem:[#allocation5 + $0x18] sm:$0xff]  ;;  %v275_v7 = vld [vmem:[#allocation5 + $0x20] sm:$0xff]  ;;  %s1246_s25 = scalar_lea.vmem [#allocation7], %s675_s18  ;;  %s1311_s27 = scalar_lea.hbm %s1364_s3, %s684_s26 }
  0x58   : > { %v689_v6 = vpack.c.bf16 %v274_v5, %v273_v3  ;;  %v276_v8 = vld [vmem:[#allocation5 + $0x28] sm:$0xff]  ;;  %v277_v10 = vld [vmem:[#allocation5 + $0x30] sm:$0xff]  ;;  %v278_v11 = vld [vmem:[#allocation5 + $0x38] sm:$0xff]  ;;  %s581_s5 = sshll.u32 %s1246_s25, 4  ;;  %s568_s16 = scalar_lea.sflag [#allocation4], %s1128_s6  ;;  %s1313_s5 = int_to_ptr.vmem [resolvable:$true] %s581_s5 }
  0x59   : > { %687 = vmatpush1.bf16.msra.mxu0 %v686_v4  ;;  %749 = vmatpush1.bf16.msra.mxu1 %v686_v4  ;;  %v692_v9 = vpack.c.bf16 %v276_v8, %v275_v7  ;;  %v208_v12 = vld [vmem:[%s1132_s9 + $0x8] sm:$0xff]  ;;  %v695_v13 = vpack.c.bf16 %v278_v11, %v277_v10  ;;  %v279_v15 = vld [vmem:[#allocation5 + $0x40] sm:$0xff]  ;;  %v281_v18 = vld [vmem:[#allocation5 + $0x50] sm:$0xff]  ;;  %s887_s28 = scalar_lea.vmem %s1313_s5, 4096  ;;  %s966_s29 = smov [#allocation7]  }
  0x5a   : > { %688 = vmatprep.subr.bf16.mxu0 %v965_v0  ;;  %734 = vmatprep.subr.bf16.mxu1 %v965_v0  ;;  %v240_v14 = vld [vmem:[%s1132_s9 + $0x108] sm:$0xff]  ;;  %v282_v19 = vld [vmem:[#allocation5 + $0x58] sm:$0xff]  ;;  %v283_v21 = vld [vmem:[#allocation5 + $0x60] sm:$0xff]  ;;  %p888_p4 = scmp.ne.s32.totalorder %s1313_s5, %s887_s28  ;;  %s891_s23 = sshll.u32 %s966_s29, 4  ;;  %s892_s23 = int_to_ptr.vmem [resolvable:$false] %s891_s23 }
  0x5b   : > { %v280_v16 = vld [vmem:[#allocation5 + $0x48] sm:$0xff]  ;;  %374 = vmatprep.mubr.f32.mxu0 %v208_v12  ;;  %454 = vmatprep.mubr.f32.mxu1 %v240_v14  ;;  %v701_v20 = vpack.c.bf16 %v282_v19, %v281_v18  ;;  %v285_v24 = vld [vmem:[#allocation5 + $0x70] sm:$0xff]  ;;  %v286_v25 = vld [vmem:[#allocation5 + $0x78] sm:$0xff]  ;;  %s893_s30 = scalar_lea.vmem %s892_s23, 8192  ;;  %p894_p10 = scmp.lt.s32.totalorder %s1313_s5, %s892_s23 }
  0x5c   : > { %v698_v17 = vpack.c.bf16 %v280_v16, %v279_v15  ;;  %v284_v22 = vld [vmem:[#allocation5 + $0x68] sm:$0xff]  ;;  %v707_v26 = vpack.c.bf16 %v286_v25, %v285_v24  ;;  %v287_v27 = vld [vmem:[#allocation5 + $0x80] sm:$0xff]  ;;  %v289_v30 = vld [vmem:[#allocation5 + $0x90] sm:$0xff]  ;;  %p889_p6 = pnand %p888_p4, %p1080_p12  ;;  %p895_p13 = scmp.lt.s32.totalorder %s893_s30, %s887_s28 }
  0x5d   : > { %690 = vmatpush1.bf16.msra.mxu0 %v689_v6  ;;  %750 = vmatpush1.bf16.msra.mxu1 %v689_v6  ;;  %v704_v23 = vpack.c.bf16 %v284_v22, %v283_v21  ;;  %v288_v28 = vld [vmem:[#allocation5 + $0x88] sm:$0xff]  ;;  %v290_v31 = vld [vmem:[#allocation5 + $0x98] sm:$0xff]  ;;  %v291_v33 = vld [vmem:[#allocation5 + $0xa0] sm:$0xff] }
  0x5e   : > { %691 = vmatprep.subr.bf16.mxu0 %v965_v0  ;;  %735 = vmatprep.subr.bf16.mxu1 %v965_v0  ;;  %v710_v29 = vpack.c.bf16 %v288_v28, %v287_v27  ;;  %v713_v32 = vpack.c.bf16 %v290_v31, %v289_v30  ;;  %v292_v34 = vld [vmem:[#allocation5 + $0xa8] sm:$0xff]  ;;  %v293_v36 = vld [vmem:[#allocation5 + $0xb0] sm:$0xff]  ;;  %v294_v37 = vld [vmem:[#allocation5 + $0xb8] sm:$0xff]  ;;  %p890_p8 = pneg %p889_p6  ;;  %p896_p3 = por %p895_p13, %p894_p10 }
  0x5f   : > { %v716_v35 = vpack.c.bf16 %v292_v34, %v291_v33  ;;  %v719_v38 = vpack.c.bf16 %v294_v37, %v293_v36  ;;  %v295_v39 = vld [vmem:[#allocation5 + $0xc0] sm:$0xff]  ;;  %v296_v40 = vld [vmem:[#allocation5 + $0xc8] sm:$0xff]  ;;  %v297_v42 = vld [vmem:[#allocation5 + $0xd0] sm:$0xff] }
  0x60   : > { %v722_v41 = vpack.c.bf16 %v296_v40, %v295_v39  ;;  %v298_v43 = vld [vmem:[#allocation5 + $0xd8] sm:$0xff]  ;;  %v299_v45 = vld [vmem:[#allocation5 + $0xe0] sm:$0xff]  ;;  %v300_v46 = vld [vmem:[#allocation5 + $0xe8] sm:$0xff]  ;;  %p897_p7 = pnand %p896_p3, %p890_p8 }
  0x61   : > { %693 = vmatpush1.bf16.msra.mxu0 %v692_v9  ;;  %751 = vmatpush1.bf16.msra.mxu1 %v692_v9  ;;  %v725_v44 = vpack.c.bf16 %v298_v43, %v297_v42  ;;  %v728_v47 = vpack.c.bf16 %v300_v46, %v299_v45  ;;  %v301_v48 = vld [vmem:[#allocation5 + $0xf0] sm:$0xff]  ;;  %v302_v49 = vld [vmem:[#allocation5 + $0xf8] sm:$0xff]  ;;  %v207_v51 = vld [vmem:[%s1132_s9] sm:$0xff] }
  0x62   : > { %694 = vmatprep.subr.bf16.mxu0 %v965_v0  ;;  %736 = vmatprep.subr.bf16.mxu1 %v965_v0  ;;  %v731_v50 = vpack.c.bf16 %v302_v49, %v301_v48  ;;  %v239_v52 = vld [vmem:[%s1132_s9 + $0x100] sm:$0xff]  ;;  %v210_v53 = vld [vmem:[%s1132_s9 + $0x18] sm:$0xff]  ;;  %v209_v55 = vld [vmem:[%s1132_s9 + $0x10] sm:$0xff] }
  0x63   : > { %v242_v54 = vld [vmem:[%s1132_s9 + $0x118] sm:$0xff]  ;;  %v241_v56 = vld [vmem:[%s1132_s9 + $0x110] sm:$0xff]  ;;  %v212_v57 = vld [vmem:[%s1132_s9 + $0x28] sm:$0xff] }
  0x64   : > { %v244_v58 = vld [vmem:[%s1132_s9 + $0x128] sm:$0xff]  ;;  %v211_v59 = vld [vmem:[%s1132_s9 + $0x20] sm:$0xff]  ;;  %v214_v61 = vld [vmem:[%s1132_s9 + $0x38] sm:$0xff] }
  0x65   : > { %696 = vmatpush1.bf16.msra.mxu0 %v695_v13  ;;  %752 = vmatpush1.bf16.msra.mxu1 %v695_v13  ;;  %v243_v60 = vld [vmem:[%s1132_s9 + $0x120] sm:$0xff]  ;;  %v246_v62 = vld [vmem:[%s1132_s9 + $0x138] sm:$0xff]  ;;  %v213_v63 = vld [vmem:[%s1132_s9 + $0x30] sm:$0xff] }
  0x66   : > { %697 = vmatprep.subr.bf16.mxu0 %v965_v0  ;;  %737 = vmatprep.subr.bf16.mxu1 %v965_v0  ;;  %v216_v1 = vld [vmem:[%s1132_s9 + $0x48] sm:$0xff]  ;;  %v215_v3 = vld [vmem:[%s1132_s9 + $0x40] sm:$0xff]  ;;  %v218_v5 = vld [vmem:[%s1132_s9 + $0x58] sm:$0xff] }
  0x67   : > { %v248_v2 = vld [vmem:[%s1132_s9 + $0x148] sm:$0xff]  ;;  %v247_v4 = vld [vmem:[%s1132_s9 + $0x140] sm:$0xff]  ;;  %v250_v6 = vld [vmem:[%s1132_s9 + $0x158] sm:$0xff] }
  0x68   : > { %v217_v7 = vld [vmem:[%s1132_s9 + $0x50] sm:$0xff]  ;;  %v220_v9 = vld [vmem:[%s1132_s9 + $0x68] sm:$0xff]  ;;  %v219_v11 = vld [vmem:[%s1132_s9 + $0x60] sm:$0xff] }
  0x69   : > { %699 = vmatpush1.bf16.msra.mxu0 %v698_v17  ;;  %753 = vmatpush1.bf16.msra.mxu1 %v698_v17  ;;  %v249_v8 = vld [vmem:[%s1132_s9 + $0x150] sm:$0xff]  ;;  %v252_v10 = vld [vmem:[%s1132_s9 + $0x168] sm:$0xff]  ;;  %v251_v12 = vld [vmem:[%s1132_s9 + $0x160] sm:$0xff] }
  0x6a   : > { %700 = vmatprep.subr.bf16.mxu0 %v965_v0  ;;  %738 = vmatprep.subr.bf16.mxu1 %v965_v0  ;;  %v222_v13 = vld [vmem:[%s1132_s9 + $0x78] sm:$0xff]  ;;  %v221_v15 = vld [vmem:[%s1132_s9 + $0x70] sm:$0xff]  ;;  %v224_v17 = vld [vmem:[%s1132_s9 + $0x88] sm:$0xff] }
  0x6b   : > { %v254_v14 = vld [vmem:[%s1132_s9 + $0x178] sm:$0xff]  ;;  %v253_v16 = vld [vmem:[%s1132_s9 + $0x170] sm:$0xff]  ;;  %v256_v18 = vld [vmem:[%s1132_s9 + $0x188] sm:$0xff] }
  0x6c   : > { %v223_v19 = vld [vmem:[%s1132_s9 + $0x80] sm:$0xff]  ;;  %v226_v21 = vld [vmem:[%s1132_s9 + $0x98] sm:$0xff]  ;;  %v257_v24 = vld [vmem:[%s1132_s9 + $0x190] sm:$0xff] }
  0x6d   : > { %702 = vmatpush1.bf16.msra.mxu0 %v701_v20  ;;  %754 = vmatpush1.bf16.msra.mxu1 %v701_v20  ;;  %v255_v20 = vld [vmem:[%s1132_s9 + $0x180] sm:$0xff]  ;;  %v258_v22 = vld [vmem:[%s1132_s9 + $0x198] sm:$0xff]  ;;  %v228_v25 = vld [vmem:[%s1132_s9 + $0xa8] sm:$0xff] }
  0x6e   : > { %703 = vmatprep.subr.bf16.mxu0 %v965_v0  ;;  %739 = vmatprep.subr.bf16.mxu1 %v965_v0  ;;  %v227_v27 = vld [vmem:[%s1132_s9 + $0xa0] sm:$0xff]  ;;  %v262_v30 = vld [vmem:[%s1132_s9 + $0x1b8] sm:$0xff]  ;;  %v229_v31 = vld [vmem:[%s1132_s9 + $0xb0] sm:$0xff] }
  0x6f   : > { %v259_v28 = vld [vmem:[%s1132_s9 + $0x1a0] sm:$0xff]  ;;  %v232_v33 = vld [vmem:[%s1132_s9 + $0xc8] sm:$0xff]  ;;  %v234_v37 = vld [vmem:[%s1132_s9 + $0xd8] sm:$0xff] }
  0x70   : > { %v264_v34 = vld [vmem:[%s1132_s9 + $0x1c8] sm:$0xff]  ;;  %v263_v36 = vld [vmem:[%s1132_s9 + $0x1c0] sm:$0xff]  ;;  %v233_v39 = vld [vmem:[%s1132_s9 + $0xd0] sm:$0xff] }
  0x71   : > { %705 = vmatpush1.bf16.msra.mxu0 %v704_v23  ;;  %755 = vmatpush1.bf16.msra.mxu1 %v704_v23  ;;  %v225_v23 = vld [vmem:[%s1132_s9 + $0x90] sm:$0xff]  ;;  %v268_v42 = vld [vmem:[%s1132_s9 + $0x1e8] sm:$0xff]  ;;  %v235_v43 = vld [vmem:[%s1132_s9 + $0xe0] sm:$0xff] }
  0x72   : > { %706 = vmatprep.subr.bf16.mxu0 %v965_v0  ;;  %740 = vmatprep.subr.bf16.mxu1 %v965_v0  ;;  %v265_v40 = vld [vmem:[%s1132_s9 + $0x1d0] sm:$0xff]  ;;  %v238_v45 = vld [vmem:[%s1132_s9 + $0xf8] sm:$0xff]  ;;  %v1242_v49 = vld [vmem:[%s1363_s2] ss:$0 sm:$0xff] }
  0x73   : > { %v270_v46 = vld [vmem:[%s1132_s9 + $0x1f8] sm:$0xff]  ;;  %v269_v48 = vld [vmem:[%s1132_s9 + $0x1f0] sm:$0xff] }
  0x75   : > { %708 = vmatpush1.bf16.msra.mxu0 %v707_v26  ;;  %756 = vmatpush1.bf16.msra.mxu1 %v707_v26  ;;  %v260_v26 = vld [vmem:[%s1132_s9 + $0x1a8] sm:$0xff] }
  0x76   : > { %709 = vmatprep.subr.bf16.mxu0 %v965_v0  ;;  %741 = vmatprep.subr.bf16.mxu1 %v965_v0 }
  0x79   : > { %711 = vmatpush1.bf16.msra.mxu0 %v710_v29  ;;  %757 = vmatpush1.bf16.msra.mxu1 %v710_v29  ;;  %v230_v29 = vld [vmem:[%s1132_s9 + $0xb8] sm:$0xff] }
  0x7a   : > { %712 = vmatprep.subr.bf16.mxu0 %v965_v0  ;;  %742 = vmatprep.subr.bf16.mxu1 %v965_v0 }
  0x7d   : > { %714 = vmatpush1.bf16.msra.mxu0 %v713_v32  ;;  %758 = vmatpush1.bf16.msra.mxu1 %v713_v32  ;;  %v261_v32 = vld [vmem:[%s1132_s9 + $0x1b0] sm:$0xff] }
  0x7e   : > { %715 = vmatprep.subr.bf16.mxu0 %v965_v0  ;;  %743 = vmatprep.subr.bf16.mxu1 %v965_v0 }
  0x81   : > { %717 = vmatpush1.bf16.msra.mxu0 %v716_v35  ;;  %759 = vmatpush1.bf16.msra.mxu1 %v716_v35  ;;  %v231_v35 = vld [vmem:[%s1132_s9 + $0xc0] sm:$0xff] }
  0x82   : > { %718 = vmatprep.subr.bf16.mxu0 %v965_v0  ;;  %744 = vmatprep.subr.bf16.mxu1 %v965_v0 }
  0x85   : > { %720 = vmatpush1.bf16.msra.mxu0 %v719_v38  ;;  %760 = vmatpush1.bf16.msra.mxu1 %v719_v38  ;;  %v266_v38 = vld [vmem:[%s1132_s9 + $0x1d8] sm:$0xff] }
  0x86   : > { %721 = vmatprep.subr.bf16.mxu0 %v965_v0  ;;  %745 = vmatprep.subr.bf16.mxu1 %v965_v0 }
  0x89   : > { %723 = vmatpush1.bf16.msra.mxu0 %v722_v41  ;;  %761 = vmatpush1.bf16.msra.mxu1 %v722_v41  ;;  %v236_v41 = vld [vmem:[%s1132_s9 + $0xe8] sm:$0xff] }
  0x8a   : > { %724 = vmatprep.subr.bf16.mxu0 %v965_v0  ;;  %746 = vmatprep.subr.bf16.mxu1 %v965_v0 }
  0x8d   : > { %726 = vmatpush1.bf16.msra.mxu0 %v725_v44  ;;  %762 = vmatpush1.bf16.msra.mxu1 %v725_v44  ;;  %v267_v44 = vld [vmem:[%s1132_s9 + $0x1e0] sm:$0xff] }
  0x8e   : > { %727 = vmatprep.subr.bf16.mxu0 %v965_v0  ;;  %747 = vmatprep.subr.bf16.mxu1 %v965_v0 }
  0x91   : > { %729 = vmatpush1.bf16.msra.mxu0 %v728_v47  ;;  %763 = vmatpush1.bf16.msra.mxu1 %v728_v47  ;;  %v237_v47 = vld [vmem:[%s1132_s9 + $0xf0] sm:$0xff] }
  0x92   : > { %730 = vmatprep.subr.bf16.mxu0 %v965_v0  ;;  %748 = vmatprep.subr.bf16.mxu1 %v965_v0  ;;  %v245_v0 = vld [vmem:[%s1132_s9 + $0x130] sm:$0xff] }
  0x95   : > { %732 = vmatpush1.bf16.msra.mxu0 %v731_v50  ;;  %764 = vmatpush1.bf16.msra.mxu1 %v731_v50 }
  0x98   : > { %375 = vmatmul.mubr.f32.vlgmr.msra.gmra.mrb[0].mxu0 %v207_v51  ;;  %455 = vmatmul.mubr.f32.vlgmr.msra.gmra.mrb[0].mxu1 %v239_v52 }
  0x99   : > { %379 = vmatprep.mubr.f32.mxu0 %v210_v53  ;;  %459 = vmatprep.mubr.f32.mxu1 %v242_v54 }
  0x9c   : > { %380 = vmatmul.mubr.f32.gmra.mrb[2].mxu0 %v209_v55  ;;  %460 = vmatmul.mubr.f32.gmra.mrb[2].mxu1 %v241_v56 }
  0x9d   : > { %384 = vmatprep.mubr.f32.mxu0 %v212_v57  ;;  %464 = vmatprep.mubr.f32.mxu1 %v244_v58 }
  0xa0   : > { %385 = vmatmul.mubr.f32.gmra.mrb[4].mxu0 %v211_v59  ;;  %465 = vmatmul.mubr.f32.gmra.mrb[4].mxu1 %v243_v60 }
  0xa1   : > { %389 = vmatprep.mubr.f32.mxu0 %v214_v61  ;;  %469 = vmatprep.mubr.f32.mxu1 %v246_v62 }
  0xa4   : > { %390 = vmatmul.mubr.f32.gmra.mrb[6].mxu0 %v213_v63  ;;  %470 = vmatmul.mubr.f32.gmra.mrb[6].mxu1 %v245_v0 }
  0xa5   : > { %394 = vmatprep.mubr.f32.mxu0 %v216_v1  ;;  %474 = vmatprep.mubr.f32.mxu1 %v248_v2 }
  0xa8   : > { %395 = vmatmul.mubr.f32.gmra.mrb[8].mxu0 %v215_v3  ;;  %475 = vmatmul.mubr.f32.gmra.mrb[8].mxu1 %v247_v4 }
  0xa9   : > { %399 = vmatprep.mubr.f32.mxu0 %v218_v5  ;;  %479 = vmatprep.mubr.f32.mxu1 %v250_v6 }
  0xac   : > { %400 = vmatmul.mubr.f32.gmra.mrb[10].mxu0 %v217_v7  ;;  %480 = vmatmul.mubr.f32.gmra.mrb[10].mxu1 %v249_v8 }
  0xad   : > { %404 = vmatprep.mubr.f32.mxu0 %v220_v9  ;;  %484 = vmatprep.mubr.f32.mxu1 %v252_v10 }
  0xb0   : > { %405 = vmatmul.mubr.f32.gmra.mrb[12].mxu0 %v219_v11  ;;  %485 = vmatmul.mubr.f32.gmra.mrb[12].mxu1 %v251_v12 }
  0xb1   : > { %409 = vmatprep.mubr.f32.mxu0 %v222_v13  ;;  %489 = vmatprep.mubr.f32.mxu1 %v254_v14 }
  0xb4   : > { %410 = vmatmul.mubr.f32.gmra.mrb[14].mxu0 %v221_v15  ;;  %490 = vmatmul.mubr.f32.gmra.mrb[14].mxu1 %v253_v16 }
  0xb5   : > { %414 = vmatprep.mubr.f32.mxu0 %v224_v17  ;;  %494 = vmatprep.mubr.f32.mxu1 %v256_v18 }
  0xb8   : > { %415 = vmatmul.mubr.f32.gmra.mrb[16].mxu0 %v223_v19  ;;  %495 = vmatmul.mubr.f32.gmra.mrb[16].mxu1 %v255_v20 }
  0xb9   : > { %419 = vmatprep.mubr.f32.mxu0 %v226_v21  ;;  %499 = vmatprep.mubr.f32.mxu1 %v258_v22 }
  0xbc   : > { %420 = vmatmul.mubr.f32.gmra.mrb[18].mxu0 %v225_v23  ;;  %500 = vmatmul.mubr.f32.gmra.mrb[18].mxu1 %v257_v24 }
  0xbd   : > { %424 = vmatprep.mubr.f32.mxu0 %v228_v25  ;;  %504 = vmatprep.mubr.f32.mxu1 %v260_v26 }
  0xc0   : > { %425 = vmatmul.mubr.f32.gmra.mrb[20].mxu0 %v227_v27  ;;  %505 = vmatmul.mubr.f32.gmra.mrb[20].mxu1 %v259_v28 }
  0xc1   : > { %429 = vmatprep.mubr.f32.mxu0 %v230_v29  ;;  %509 = vmatprep.mubr.f32.mxu1 %v262_v30 }
  0xc4   : > { %430 = vmatmul.mubr.f32.gmra.mrb[22].mxu0 %v229_v31  ;;  %510 = vmatmul.mubr.f32.gmra.mrb[22].mxu1 %v261_v32 }
  0xc5   : > { %434 = vmatprep.mubr.f32.mxu0 %v232_v33  ;;  %514 = vmatprep.mubr.f32.mxu1 %v264_v34 }
  0xc8   : > { %435 = vmatmul.mubr.f32.gmra.mrb[24].mxu0 %v231_v35  ;;  %515 = vmatmul.mubr.f32.gmra.mrb[24].mxu1 %v263_v36 }
  0xc9   : > { %439 = vmatprep.mubr.f32.mxu0 %v234_v37  ;;  %519 = vmatprep.mubr.f32.mxu1 %v266_v38 }
  0xcc   : > { %440 = vmatmul.mubr.f32.gmra.mrb[26].mxu0 %v233_v39  ;;  %520 = vmatmul.mubr.f32.gmra.mrb[26].mxu1 %v265_v40 }
  0xcd   : > { %444 = vmatprep.mubr.f32.mxu0 %v236_v41  ;;  %524 = vmatprep.mubr.f32.mxu1 %v268_v42 }
  0xd0   : > { %445 = vmatmul.mubr.f32.gmra.mrb[28].mxu0 %v235_v43  ;;  %525 = vmatmul.mubr.f32.gmra.mrb[28].mxu1 %v267_v44 }
  0xd1   : > { %449 = vmatprep.mubr.f32.mxu0 %v238_v45  ;;  %529 = vmatprep.mubr.f32.mxu1 %v270_v46 }
  0xd4   : > { %450 = vmatmul.mubr.f32.gmra.mrb[30].mxu0 %v237_v47  ;;  %530 = vmatmul.mubr.f32.gmra.mrb[30].mxu1 %v269_v48 }
 0x16b   : > { %v376_v50 = vpop.f32.mrb[0].mxu0  ;;  %v456_v51 = vpop.f32.mrb[0].mxu1 }
 0x16c   : > { %v377_v52 = vadd.f32 %v1242_v49, %v376_v50  ;;  %v457_v53 = vadd.f32 %v1242_v49, %v456_v51  ;;  %v378_v54 = vpop.f32.mrb[1].mxu0  ;;  %v458_v55 = vpop.f32.mrb[1].mxu1 }
 0x16e   : > { %535 = vst [vmem:[%s1246_s25] sm:$0xff] %v377_v52  ;;  %551 = vst [vmem:[%s1246_s25 + $0x80] sm:$0xff] %v457_v53 }
 0x16f   : > { %v381_v56 = vpop.f32.mrb[2].mxu0  ;;  %v461_v57 = vpop.f32.mrb[2].mxu1 }
 0x170   : > { %v382_v58 = vadd.f32 %v1242_v49, %v381_v56  ;;  %v462_v59 = vadd.f32 %v1242_v49, %v461_v57  ;;  %v383_v60 = vpop.f32.mrb[3].mxu0  ;;  %v463_v61 = vpop.f32.mrb[3].mxu1 }
 0x172   : > { %536 = vst [vmem:[%s1246_s25 + $0x8] sm:$0xff] %v382_v58  ;;  %552 = vst [vmem:[%s1246_s25 + $0x88] sm:$0xff] %v462_v59 }
 0x173   : > { %v386_v62 = vpop.f32.mrb[4].mxu0  ;;  %v466_v63 = vpop.f32.mrb[4].mxu1 }
 0x174   : > { %v387_v0 = vadd.f32 %v1242_v49, %v386_v62  ;;  %v467_v1 = vadd.f32 %v1242_v49, %v466_v63  ;;  %v388_v2 = vpop.f32.mrb[5].mxu0  ;;  %v468_v3 = vpop.f32.mrb[5].mxu1 }
 0x176   : > { %537 = vst [vmem:[%s1246_s25 + $0x10] sm:$0xff] %v387_v0  ;;  %553 = vst [vmem:[%s1246_s25 + $0x90] sm:$0xff] %v467_v1 }
 0x177   : > { %v391_v4 = vpop.f32.mrb[6].mxu0  ;;  %v471_v5 = vpop.f32.mrb[6].mxu1 }
 0x178   : > { %v392_v6 = vadd.f32 %v1242_v49, %v391_v4  ;;  %v472_v7 = vadd.f32 %v1242_v49, %v471_v5  ;;  %v393_v8 = vpop.f32.mrb[7].mxu0  ;;  %v473_v9 = vpop.f32.mrb[7].mxu1 }
 0x17a   : > { %538 = vst [vmem:[%s1246_s25 + $0x18] sm:$0xff] %v392_v6  ;;  %554 = vst [vmem:[%s1246_s25 + $0x98] sm:$0xff] %v472_v7 }
 0x17b   : > { %v396_v10 = vpop.f32.mrb[8].mxu0  ;;  %v476_v11 = vpop.f32.mrb[8].mxu1 }
 0x17c   : > { %v397_v12 = vadd.f32 %v1242_v49, %v396_v10  ;;  %v477_v13 = vadd.f32 %v1242_v49, %v476_v11  ;;  %v398_v14 = vpop.f32.mrb[9].mxu0  ;;  %v478_v15 = vpop.f32.mrb[9].mxu1 }
 0x17e   : > { %539 = vst [vmem:[%s1246_s25 + $0x20] sm:$0xff] %v397_v12  ;;  %555 = vst [vmem:[%s1246_s25 + $0xa0] sm:$0xff] %v477_v13 }
 0x17f   : > { %v401_v16 = vpop.f32.mrb[10].mxu0  ;;  %v481_v17 = vpop.f32.mrb[10].mxu1 }
 0x180   : > { %v402_v18 = vadd.f32 %v1242_v49, %v401_v16  ;;  %v482_v19 = vadd.f32 %v1242_v49, %v481_v17  ;;  %v403_v20 = vpop.f32.mrb[11].mxu0  ;;  %v483_v21 = vpop.f32.mrb[11].mxu1 }
 0x182   : > { %540 = vst [vmem:[%s1246_s25 + $0x28] sm:$0xff] %v402_v18  ;;  %556 = vst [vmem:[%s1246_s25 + $0xa8] sm:$0xff] %v482_v19 }
 0x183   : > { %v406_v22 = vpop.f32.mrb[12].mxu0  ;;  %v486_v23 = vpop.f32.mrb[12].mxu1 }
 0x184   : > { %v407_v24 = vadd.f32 %v1242_v49, %v406_v22  ;;  %v487_v25 = vadd.f32 %v1242_v49, %v486_v23  ;;  %v408_v26 = vpop.f32.mrb[13].mxu0  ;;  %v488_v27 = vpop.f32.mrb[13].mxu1 }
 0x186   : > { %541 = vst [vmem:[%s1246_s25 + $0x30] sm:$0xff] %v407_v24  ;;  %557 = vst [vmem:[%s1246_s25 + $0xb0] sm:$0xff] %v487_v25 }
 0x187   : > { %v411_v28 = vpop.f32.mrb[14].mxu0  ;;  %v491_v29 = vpop.f32.mrb[14].mxu1 }
 0x188   : > { %v412_v30 = vadd.f32 %v1242_v49, %v411_v28  ;;  %v492_v31 = vadd.f32 %v1242_v49, %v491_v29  ;;  %v413_v32 = vpop.f32.mrb[15].mxu0  ;;  %v493_v33 = vpop.f32.mrb[15].mxu1 }
 0x18a   : > { %542 = vst [vmem:[%s1246_s25 + $0x38] sm:$0xff] %v412_v30  ;;  %558 = vst [vmem:[%s1246_s25 + $0xb8] sm:$0xff] %v492_v31 }
 0x18b   : > { %v416_v34 = vpop.f32.mrb[16].mxu0  ;;  %v496_v35 = vpop.f32.mrb[16].mxu1 }
 0x18c   : > { %v417_v36 = vadd.f32 %v1242_v49, %v416_v34  ;;  %v497_v37 = vadd.f32 %v1242_v49, %v496_v35  ;;  %v418_v38 = vpop.f32.mrb[17].mxu0  ;;  %v498_v39 = vpop.f32.mrb[17].mxu1 }
 0x18e   : > { %543 = vst [vmem:[%s1246_s25 + $0x40] sm:$0xff] %v417_v36  ;;  %559 = vst [vmem:[%s1246_s25 + $0xc0] sm:$0xff] %v497_v37 }
 0x18f   : > { %v421_v40 = vpop.f32.mrb[18].mxu0  ;;  %v501_v41 = vpop.f32.mrb[18].mxu1 }
 0x190   : > { %v422_v42 = vadd.f32 %v1242_v49, %v421_v40  ;;  %v502_v43 = vadd.f32 %v1242_v49, %v501_v41  ;;  %v423_v44 = vpop.f32.mrb[19].mxu0  ;;  %v503_v45 = vpop.f32.mrb[19].mxu1 }
 0x192   : > { %544 = vst [vmem:[%s1246_s25 + $0x48] sm:$0xff] %v422_v42  ;;  %560 = vst [vmem:[%s1246_s25 + $0xc8] sm:$0xff] %v502_v43 }
 0x193   : > { %v426_v46 = vpop.f32.mrb[20].mxu0  ;;  %v506_v47 = vpop.f32.mrb[20].mxu1 }
 0x194   : > { %v427_v48 = vadd.f32 %v1242_v49, %v426_v46  ;;  %v507_v50 = vadd.f32 %v1242_v49, %v506_v47  ;;  %v428_v51 = vpop.f32.mrb[21].mxu0  ;;  %v508_v52 = vpop.f32.mrb[21].mxu1 }
 0x196   : > { %545 = vst [vmem:[%s1246_s25 + $0x50] sm:$0xff] %v427_v48  ;;  %561 = vst [vmem:[%s1246_s25 + $0xd0] sm:$0xff] %v507_v50 }
 0x197   : > { %v431_v53 = vpop.f32.mrb[22].mxu0  ;;  %v511_v54 = vpop.f32.mrb[22].mxu1 }
 0x198   : > { %v432_v55 = vadd.f32 %v1242_v49, %v431_v53  ;;  %v512_v56 = vadd.f32 %v1242_v49, %v511_v54  ;;  %v433_v57 = vpop.f32.mrb[23].mxu0  ;;  %v513_v58 = vpop.f32.mrb[23].mxu1 }
 0x19a   : > { %546 = vst [vmem:[%s1246_s25 + $0x58] sm:$0xff] %v432_v55  ;;  %562 = vst [vmem:[%s1246_s25 + $0xd8] sm:$0xff] %v512_v56 }
 0x19b   : > { %v436_v59 = vpop.f32.mrb[24].mxu0  ;;  %v516_v60 = vpop.f32.mrb[24].mxu1 }
 0x19c   : > { %v437_v61 = vadd.f32 %v1242_v49, %v436_v59  ;;  %v517_v62 = vadd.f32 %v1242_v49, %v516_v60  ;;  %v438_v63 = vpop.f32.mrb[25].mxu0  ;;  %v518_v0 = vpop.f32.mrb[25].mxu1 }
 0x19e   : > { %547 = vst [vmem:[%s1246_s25 + $0x60] sm:$0xff] %v437_v61  ;;  %563 = vst [vmem:[%s1246_s25 + $0xe0] sm:$0xff] %v517_v62 }
 0x19f   : > { %v441_v1 = vpop.f32.mrb[26].mxu0  ;;  %v521_v2 = vpop.f32.mrb[26].mxu1 }
 0x1a0   : > { %v442_v3 = vadd.f32 %v1242_v49, %v441_v1  ;;  %v522_v4 = vadd.f32 %v1242_v49, %v521_v2  ;;  %v443_v5 = vpop.f32.mrb[27].mxu0  ;;  %v523_v6 = vpop.f32.mrb[27].mxu1 }
 0x1a2   : > { %548 = vst [vmem:[%s1246_s25 + $0x68] sm:$0xff] %v442_v3  ;;  %564 = vst [vmem:[%s1246_s25 + $0xe8] sm:$0xff] %v522_v4 }
 0x1a3   : > { %v446_v7 = vpop.f32.mrb[28].mxu0  ;;  %v526_v8 = vpop.f32.mrb[28].mxu1 }
 0x1a4   : > { %v447_v9 = vadd.f32 %v1242_v49, %v446_v7  ;;  %v527_v10 = vadd.f32 %v1242_v49, %v526_v8  ;;  %v448_v11 = vpop.f32.mrb[29].mxu0  ;;  %v528_v12 = vpop.f32.mrb[29].mxu1 }
 0x1a6   : > { %549 = vst [vmem:[%s1246_s25 + $0x70] sm:$0xff] %v447_v9  ;;  %565 = vst [vmem:[%s1246_s25 + $0xf0] sm:$0xff] %v527_v10 }
 0x1a7   : > { %v451_v13 = vpop.f32.mrb[30].mxu0  ;;  %v531_v14 = vpop.f32.mrb[30].mxu1 }
 0x1a8   : > { %v452_v15 = vadd.f32 %v1242_v49, %v451_v13  ;;  %v532_v16 = vadd.f32 %v1242_v49, %v531_v14  ;;  %v453_v17 = vpop.f32.mrb[31].mxu0  ;;  %v533_v18 = vpop.f32.mrb[31].mxu1 }
 0x1aa   : > { %550 = vst [vmem:[%s1246_s25 + $0x78] sm:$0xff] %v452_v15  ;;  %566 = vst [vmem:[%s1246_s25 + $0xf8] sm:$0xff] %v532_v16 }
 0x1ab   : > { %900 = shalt.err (!%p897_p7)
}
 0x1ac   : > { %s901_s22 = scalar_lea.hbm %s1311_s27, 4096  ;;  %s905_s9 = scalar_lea.hbm %s1364_s3, 8192 }
 0x1ad   : > { %p902_p9 = scmp.ne.s32.totalorder %s1311_s27, %s901_s22  ;;  %p906_p5 = scmp.lt.u32.totalorder %s1311_s27, %s1364_s3 }
 0x1ae   : > { %p907_p11 = scmp.lt.u32.totalorder %s905_s9, %s901_s22  ;;  %p909_p4 = scmp.lt.u32.totalorder %s901_s22, %s1311_s27 }
 0x1af   : > { %p903_p2 = pnand %p902_p9, %p1080_p12 }
 0x1b0   : > { %p908_p1 = por %p907_p11, %p906_p5 }
 0x1b1   : > { %p904_p0 = pneg %p903_p2 }
 0x1b2   : > { %p910_p6 = por %p909_p4, %p908_p1 }
 0x1b4   : > { %p911_p8 = pnand %p910_p6, %p904_p0 }
 0x1b6   : > { %914 = shalt.err (!%p911_p8)
}
 0x1b7   : > { %s967_s4 = smov 128   ;;  %s968_s25 = smov 8  }
 0x1b8   : > { %771 = dma.vmem_to_hbm [thread:$0]  (%p1080_p12), %s1313_s5, 4096, %s1311_s27, %s568_s16, %s967_s4, %s967_s4, %s968_s25  }
 0x1b9 PF: > { %s596_s26 = sand.u32 1, %s945_s12   ;;  %p1379_p10 = scmp.ne.s32.totalorder %s1369_s19, 0 }
 0x1ba   : > { %p1380_p13 = scmp.ge.s32.totalorder %s957_s15, 2  ;;  %s597_s10 = scalar_lea.sflag [#allocation4], %s596_s26 }
 0x1bc   : > { %p782_p3 = pnand %p1380_p13, %p1379_p10 }
 0x1be   : > { %940 = dma.done.wait (!%p782_p3), %s597_s10, 4096  }
 0x1bf   : > { %942 = vsyncadd (!%p782_p3), %s597_s10, 4294963200  ;;  %p17_p7 = scmp.ge.s32.totalorder %s1045_s24, 4   ;;  %s1381_s12 = smov %s949_s13 }
 0x1c0   : > { %s1382_s13 = smov %s953_s14  ;;  %s1383_s14 = smov %s1076_s17 }
 0x1c1   : > { %s1384_s15 = smov %s1045_s24  ;;  %19 = sbr.rel (!%p17_p7) target bundleno = 6 (0x6), region = 81 }
 0x1c8   :  { %602 = vsyncpa [#allocation3], 1 }
 0x1c9   :  { %604 = vsyncpa [#allocation3 + $0x1], 1 }
 0x1ca   :  { %605 = vsyncpa [#allocation6], 1 }
 0x1cb   :  { %606 = vsyncpa [#allocation4], 1 }
 0x1cc   :  { %608 = vsyncpa [#allocation4 + $0x1], 1 }

</bundles_post_ra>
